<compile_context>
chip_gen: v6e
topology: v6e:2x2x1
jax: 0.10.0
libtpu: 0.0.40
codegen_flags: <defaults>
</compile_context>

<pallas_src>
import functools

import jax
import jax.numpy as jnp
from jax.experimental import pallas as pl
from jax.experimental.pallas import tpu as pltpu

# ---------------- small synthetic Qwen2-style config ----------------
VOCAB = 256
HIDDEN = 64
N_LAYERS = 2
N_HEADS = 4
N_KV_HEADS = 2
HEAD_DIM = HIDDEN // N_HEADS          # 16
INTERMEDIATE = 128
LORA_RANK = 8
LORA_ALPHA = 32
LORA_SCALING = float(LORA_ALPHA) / float(LORA_RANK)
RMS_EPS = 1e-6
ROPE_THETA = 10000.0
NEG_INF = -1e9

BATCH = 2
SEQ = 8


# ---------------- Pallas kernels ----------------
def _bcast_spec(arr):
    """Full-array block replicated across the (batch) grid axis."""
    n = arr.ndim
    return pl.BlockSpec(arr.shape, lambda b, n=n: (0,) * n)


def _layer_kernel(h_ref, mask_ref, cos_ref, sin_ref, rq_ref, rk_ref,
                  in_norm_ref, qkv_w_ref, qkv_a_ref, qkv_b_ref, qkv_bias_ref,
                  o_w_ref, o_a_ref, o_b_ref,
                  post_norm_ref, gu_w_ref, gu_a_ref, gu_b_ref,
                  dn_w_ref, dn_a_ref, dn_b_ref,
                  out_ref, *,
                  seq, n_heads, n_kv_heads, head_dim, inter, eps, scale,
                  neg_inf):
    f32 = jnp.float32
    bf16 = jnp.bfloat16

    def rmsnorm(x, w):
        var = jnp.mean(x * x, axis=-1, keepdims=True)
        return x * jax.lax.rsqrt(var + eps) * w

    def lora_proj(x_bf, w_r, a_r, b_r):
        # Weights are pre-transposed; LoRA scaling folded into B.
        base = jnp.dot(x_bf, w_r[...], preferred_element_type=f32)
        ax = jnp.dot(x_bf, a_r[...], preferred_element_type=f32)
        lora = jnp.dot(ax.astype(bf16), b_r[...], preferred_element_type=f32)
        return base + lora

    h = h_ref[0].astype(f32)                               # [S, D]
    residual = h

    # --- self attention ---
    hn = rmsnorm(h, in_norm_ref[...].astype(f32))
    x_bf = hn.astype(bf16)
    qkv = lora_proj(x_bf, qkv_w_ref, qkv_a_ref, qkv_b_ref)
    qkv = qkv + qkv_bias_ref[...].astype(f32)              # [S, Dq+2*Dkv]

    dq = n_heads * head_dim
    dkv = n_kv_heads * head_dim
    q = qkv[:, :dq]
    k = qkv[:, dq:dq + dkv]
    v = qkv[:, dq + dkv:dq + 2 * dkv]

    # RoPE: rotate_half expressed as a block-diagonal matmul (MXU), per-head
    # tiled cos/sin tables (f32 elementwise epilogue).
    cos = cos_ref[...].astype(f32)                         # [S, H*Dh]
    sin = sin_ref[...].astype(f32)
    q_rot = q * cos + jnp.dot(q.astype(bf16), rq_ref[...],
                              preferred_element_type=f32) * sin
    k_rot = k * cos[:, :dkv] + jnp.dot(k.astype(bf16), rk_ref[...],
                                       preferred_element_type=f32) * sin[:, :dkv]

    # causal + padding additive mask built in-kernel (no [B,S,S] HBM tensor)
    pad = mask_ref[0].astype(f32)                          # [1, S]
    row = jax.lax.broadcasted_iota(jnp.int32, (seq, seq), 0)
    col = jax.lax.broadcasted_iota(jnp.int32, (seq, seq), 1)
    allowed = jnp.logical_and(col <= row, pad > 0.0)       # [S, S]
    add_mask = jnp.where(allowed, 0.0, neg_inf)

    rep = n_heads // n_kv_heads
    outs = []
    for hh in range(n_heads):                              # unrolled at trace time
        kv = hh // rep                                     # GQA without jnp.repeat
        q_h = q_rot[:, hh * head_dim:(hh + 1) * head_dim].astype(bf16)
        k_h = k_rot[:, kv * head_dim:(kv + 1) * head_dim].astype(bf16)
        v_h = v[:, kv * head_dim:(kv + 1) * head_dim].astype(bf16)
        # contract on the last axes directly (no in-kernel transpose)
        s = jax.lax.dot_general(q_h, k_h, (((1,), (1,)), ((), ())),
                                preferred_element_type=f32) * scale + add_mask
        s = s - jnp.max(s, axis=-1, keepdims=True)
        p = jnp.exp(s)
        p = p * pl.reciprocal(jnp.sum(p, axis=-1, keepdims=True), approx=True)
        outs.append(jnp.dot(p.astype(bf16), v_h, preferred_element_type=f32))
    attn = jnp.concatenate(outs, axis=-1)                  # [S, H*Dh]

    o = lora_proj(attn.astype(bf16), o_w_ref, o_a_ref, o_b_ref)
    h = residual + o

    # --- MLP (SwiGLU) ---
    residual = h
    hn = rmsnorm(h, post_norm_ref[...].astype(f32))
    x_bf = hn.astype(bf16)
    gu = lora_proj(x_bf, gu_w_ref, gu_a_ref, gu_b_ref)     # [S, 2*I]
    gate = gu[:, :inter]
    up = gu[:, inter:]
    act = jax.nn.silu(gate) * up                           # f32 epilogue
    down = lora_proj(act.astype(bf16), dn_w_ref, dn_a_ref, dn_b_ref)
    h = residual + down

    out_ref[0] = h.astype(out_ref.dtype)


def qwen_layer(h, mask3d, cos, sin, rq, rk, L):
    b, s, d = h.shape
    kernel = functools.partial(
        _layer_kernel, seq=s, n_heads=N_HEADS, n_kv_heads=N_KV_HEADS,
        head_dim=HEAD_DIM, inter=INTERMEDIATE, eps=RMS_EPS,
        scale=1.0 / (HEAD_DIM ** 0.5), neg_inf=NEG_INF)
    return pl.pallas_call(
        kernel,
        out_shape=jax.ShapeDtypeStruct((b, s, d), h.dtype),
        grid=(b,),
        in_specs=[
            pl.BlockSpec((1, s, d), lambda bi: (bi, 0, 0)),   # hidden state
            pl.BlockSpec((1, 1, s), lambda bi: (bi, 0, 0)),   # pad mask
            _bcast_spec(cos), _bcast_spec(sin),
            _bcast_spec(rq), _bcast_spec(rk),
            _bcast_spec(L["input_norm"]),
            _bcast_spec(L["qkv_w"]), _bcast_spec(L["qkv_a"]),
            _bcast_spec(L["qkv_b"]), _bcast_spec(L["qkv_bias"]),
            _bcast_spec(L["o_w"]), _bcast_spec(L["o_a"]), _bcast_spec(L["o_b"]),
            _bcast_spec(L["post_norm"]),
            _bcast_spec(L["gu_w"]), _bcast_spec(L["gu_a"]), _bcast_spec(L["gu_b"]),
            _bcast_spec(L["down_w"]), _bcast_spec(L["down_a"]),
            _bcast_spec(L["down_b"]),
        ],
        out_specs=pl.BlockSpec((1, s, d), lambda bi: (bi, 0, 0)),
        compiler_params=pltpu.CompilerParams(
            dimension_semantics=("parallel",)),
    )(h, mask3d, cos, sin, rq, rk,
      L["input_norm"], L["qkv_w"], L["qkv_a"], L["qkv_b"], L["qkv_bias"],
      L["o_w"], L["o_a"], L["o_b"],
      L["post_norm"], L["gu_w"], L["gu_a"], L["gu_b"],
      L["down_w"], L["down_a"], L["down_b"])


def _head_kernel(h_ref, norm_ref, w_ref, o_ref, *, eps):
    f32 = jnp.float32
    x = h_ref[0].astype(f32)                               # [S, D]
    var = jnp.mean(x * x, axis=-1, keepdims=True)
    hn = x * jax.lax.rsqrt(var + eps) * norm_ref[...].astype(f32)
    o_ref[0] = jnp.dot(hn.astype(jnp.bfloat16), w_ref[...],
                       preferred_element_type=f32).astype(o_ref.dtype)


def lm_head(h, final_norm, w_lm):
    b, s, d = h.shape
    v = w_lm.shape[1]
    return pl.pallas_call(
        functools.partial(_head_kernel, eps=RMS_EPS),
        out_shape=jax.ShapeDtypeStruct((b, s, v), jnp.float32),
        grid=(b,),
        in_specs=[pl.BlockSpec((1, s, d), lambda bi: (bi, 0, 0)),
                  _bcast_spec(final_norm), _bcast_spec(w_lm)],
        out_specs=pl.BlockSpec((1, s, v), lambda bi: (bi, 0, 0)),
        compiler_params=pltpu.CompilerParams(
            dimension_semantics=("parallel",)),
    )(h, final_norm, w_lm)


# ---------------- RoPE tables & parameter prep ----------------
def rope_tables(seq, head_dim=HEAD_DIM, n_heads=N_HEADS, theta=ROPE_THETA):
    inv_freq = 1.0 / (theta ** (jnp.arange(0, head_dim, 2, dtype=jnp.float32)
                                / head_dim))
    t = jnp.arange(seq, dtype=jnp.float32)
    freqs = jnp.outer(t, inv_freq)
    emb = jnp.concatenate([freqs, freqs], axis=-1)         # [S, Dh]
    cos = jnp.tile(jnp.cos(emb), (1, n_heads))             # [S, H*Dh]
    sin = jnp.tile(jnp.sin(emb), (1, n_heads))
    return cos, sin


def rotate_mats(head_dim=HEAD_DIM):
    # rotate_half(x) == x @ R with R = [[0, I], [-I, 0]] (per head); block-diag
    # over heads so the whole [S, H*Dh] tensor is rotated with one MXU matmul.
    half = head_dim // 2
    idx = jnp.arange(half)
    r = jnp.zeros((head_dim, head_dim), jnp.float32)
    r = r.at[idx + half, idx].set(-1.0)
    r = r.at[idx, idx + half].set(1.0)
    rq = jnp.kron(jnp.eye(N_HEADS, dtype=jnp.float32), r).astype(jnp.bfloat16)
    rk = jnp.kron(jnp.eye(N_KV_HEADS, dtype=jnp.float32), r).astype(jnp.bfloat16)
    return rq, rk


def init_params(key):
    """PyTorch-style parameters: Linear W [out,in]; LoRA A [r,in], B [out,r]."""
    def nrm(k, shape, scale=0.02):
        return (scale * jax.random.normal(k, shape)).astype(jnp.float32)

    keys = iter(jax.random.split(key, 256))
    params = {
        "embed": nrm(next(keys), (VOCAB, HIDDEN)),
        "final_norm": jnp.ones((HIDDEN,), jnp.float32),
        "lm_head": nrm(next(keys), (VOCAB, HIDDEN)),
        "layers": [],
    }

    def lora_pair(din, dout):
        # PEFT inits B to zeros; use small nonzero values so LoRA path is exercised.
        return nrm(next(keys), (LORA_RANK, din)), nrm(next(keys), (dout, LORA_RANK), 0.01)

    for _ in range(N_LAYERS):
        layer = {}
        layer["input_norm"] = jnp.ones((HIDDEN,), jnp.float32)
        layer["post_norm"] = jnp.ones((HIDDEN,), jnp.float32)
        for name, dout in (("q", N_HEADS * HEAD_DIM),
                           ("k", N_KV_HEADS * HEAD_DIM),
                           ("v", N_KV_HEADS * HEAD_DIM),
                           ("o", HIDDEN)):
            din = HIDDEN if name != "o" else N_HEADS * HEAD_DIM
            layer[f"{name}_w"] = nrm(next(keys), (dout, din))
            layer[f"{name}_a"], layer[f"{name}_b"] = lora_pair(din, dout)
            if name in ("q", "k", "v"):
                layer[f"{name}_bias"] = nrm(next(keys), (dout,))
        for name, din, dout in (("gate", HIDDEN, INTERMEDIATE),
                                ("up", HIDDEN, INTERMEDIATE),
                                ("down", INTERMEDIATE, HIDDEN)):
            layer[f"{name}_w"] = nrm(next(keys), (dout, din))
            layer[f"{name}_a"], layer[f"{name}_b"] = lora_pair(din, dout)
        params["layers"].append(layer)
    return params


def prepare_params(raw):
    """Fold/transpose PyTorch-style params into the fused kernel layout (bf16)."""
    bf16 = jnp.bfloat16
    dq = N_HEADS * HEAD_DIM
    dkv = N_KV_HEADS * HEAD_DIM
    r = LORA_RANK

    def b_scaled(b):                     # [dout, r] -> [r, dout] with scaling folded
        return LORA_SCALING * b.T

    out = {
        "embed": raw["embed"].astype(bf16),
        "final_norm": raw["final_norm"].reshape(1, HIDDEN).astype(jnp.float32),
        "lm_head": raw["lm_head"].T.astype(bf16),          # [D, V]
        "layers": [],
    }
    for lay in raw["layers"]:
        L = {}
        L["input_norm"] = lay["input_norm"].reshape(1, HIDDEN)
        L["post_norm"] = lay["post_norm"].reshape(1, HIDDEN)

        # fused QKV: base [D, Dq+2*Dkv], LoRA A concat, LoRA B block-diagonal
        L["qkv_w"] = jnp.concatenate(
            [lay["q_w"], lay["k_w"], lay["v_w"]], axis=0).T.astype(bf16)
        L["qkv_a"] = jnp.concatenate(
            [lay["q_a"].T, lay["k_a"].T, lay["v_a"].T], axis=1).astype(bf16)
        qkv_b = jnp.zeros((3 * r, dq + 2 * dkv), jnp.float32)
        qkv_b = qkv_b.at[0:r, 0:dq].set(b_scaled(lay["q_b"]))
        qkv_b = qkv_b.at[r:2 * r, dq:dq + dkv].set(b_scaled(lay["k_b"]))
        qkv_b = qkv_b.at[2 * r:3 * r, dq + dkv:dq + 2 * dkv].set(b_scaled(lay["v_b"]))
        L["qkv_b"] = qkv_b.astype(bf16)
        L["qkv_bias"] = jnp.concatenate(
            [lay["q_bias"], lay["k_bias"], lay["v_bias"]]).reshape(1, -1)

        L["o_w"] = lay["o_w"].T.astype(bf16)
        L["o_a"] = lay["o_a"].T.astype(bf16)
        L["o_b"] = b_scaled(lay["o_b"]).astype(bf16)

        # fused gate/up
        L["gu_w"] = jnp.concatenate(
            [lay["gate_w"], lay["up_w"]], axis=0).T.astype(bf16)  # [D, 2*I]
        L["gu_a"] = jnp.concatenate(
            [lay["gate_a"].T, lay["up_a"].T], axis=1).astype(bf16)
        gu_b = jnp.zeros((2 * r, 2 * INTERMEDIATE), jnp.float32)
        gu_b = gu_b.at[:r, :INTERMEDIATE].set(b_scaled(lay["gate_b"]))
        gu_b = gu_b.at[r:, INTERMEDIATE:].set(b_scaled(lay["up_b"]))
        L["gu_b"] = gu_b.astype(bf16)

        L["down_w"] = lay["down_w"].T.astype(bf16)          # [I, D]
        L["down_a"] = lay["down_a"].T.astype(bf16)
        L["down_b"] = b_scaled(lay["down_b"]).astype(bf16)
        out["layers"].append(L)
    return out


# ---------------- forward ----------------
def forward(params, input_ids, attention_mask, labels=None):
    b, s = input_ids.shape
    h = params["embed"][input_ids]                          # [B, S, D] bf16
    mask3d = attention_mask.astype(jnp.float32).reshape(b, 1, s)
    cos, sin = rope_tables(s)
    rq, rk = rotate_mats()

    for layer in params["layers"]:
        h = qwen_layer(h, mask3d, cos, sin, rq, rk, layer)

    logits = lm_head(h, params["final_norm"], params["lm_head"])  # [B,S,V] f32

    loss = None
    if labels is not None:
        shift_logits = logits[:, :-1, :].astype(jnp.float32)
        shift_labels = labels[:, 1:]
        logp = jax.nn.log_softmax(shift_logits, axis=-1)
        valid = shift_labels != -100
        safe = jnp.where(valid, shift_labels, 0)
        tok_ll = jnp.take_along_axis(logp, safe[..., None], axis=-1)[..., 0]
        loss = -jnp.sum(jnp.where(valid, tok_ll, 0.0)) / jnp.maximum(
            jnp.sum(valid.astype(jnp.float32)), 1.0)
    return loss, logits


if __name__ == "__main__":
    key = jax.random.PRNGKey(0)
    k_params, k_ids = jax.random.split(key)
    raw_params = init_params(k_params)
    params = prepare_params(raw_params)

    input_ids = jax.random.randint(k_ids, (BATCH, SEQ), 0, VOCAB, dtype=jnp.int32)
    # batch 0: fully attended; batch 1: last 2 positions are padding
    attention_mask = jnp.array(
        [[1] * SEQ, [1] * (SEQ - 2) + [0] * 2], dtype=jnp.int32)
    # labels: first 3 "prompt" tokens and padded positions masked with -100
    labels = jnp.where(attention_mask == 1, input_ids, -100)
    labels = labels.at[:, :3].set(-100)

    loss, logits = jax.jit(forward)(params, input_ids, attention_mask, labels)
    jax.block_until_ready((loss, logits))
    assert logits.shape == (BATCH, SEQ, VOCAB)
    assert jnp.isfinite(loss)
    print("KERNEL_OK")
</pallas_src>

<mosaic_0001>
module attributes {stable_mosaic.version = 11 : i64} {
  func.func @_head_kernel(%arg0: i32, %arg1: memref<1x8x64xbf16, #tpu.memory_space<vmem>>, %arg2: memref<1x64xf32, #tpu.memory_space<vmem>>, %arg3: memref<64x256xbf16, #tpu.memory_space<vmem>>, %arg4: memref<1x8x256xf32, #tpu.memory_space<vmem>>) attributes {dimension_semantics = [#tpu.dimension_semantics<parallel>], iteration_bounds = array<i64: 2>, scalar_prefetch = 0 : i64, scratch_operands = 0 : i64, tpu.core_type = #tpu.core_type<tc>, window_params = [{transform_indices = @transform_0, window_bounds = array<i64: 1, 8, 64>}, {pipeline_mode = #tpu.pipeline_mode<synchronous>, transform_indices = @transform_1, window_bounds = array<i64: 1, 64>}, {pipeline_mode = #tpu.pipeline_mode<synchronous>, transform_indices = @transform_2, window_bounds = array<i64: 64, 256>}, {transform_indices = @transform_3, window_bounds = array<i64: 1, 8, 256>}]} {
    %c0 = arith.constant 0 : index
    %c0_0 = arith.constant 0 : index
    %c0_1 = arith.constant 0 : index
    %0 = vector.load %arg1[%c0, %c0_0, %c0_1] : memref<1x8x64xbf16, #tpu.memory_space<vmem>>, vector<1x8x64xbf16>
    %1 = vector.shape_cast %0 : vector<1x8x64xbf16> to vector<8x64xbf16>
    %2 = arith.extf %1 : vector<8x64xbf16> to vector<8x64xf32>
    %3 = arith.mulf %2, %2 : vector<8x64xf32>
    %cst = arith.constant dense<0.000000e+00> : vector<8xf32>
    %4 = vector.multi_reduction <add>, %3, %cst [1] : vector<8x64xf32> to vector<8xf32>
    %5 = vector.shape_cast %4 : vector<8xf32> to vector<8x1xf32>
    %cst_2 = arith.constant 6.400000e+01 : f32
    %6 = vector.broadcast %cst_2 : f32 to vector<8x1xf32>
    %7 = arith.divf %5, %6 : vector<8x1xf32>
    %cst_3 = arith.constant 9.99999997E-7 : f32
    %8 = vector.broadcast %cst_3 : f32 to vector<8x1xf32>
    %9 = arith.addf %7, %8 : vector<8x1xf32>
    %10 = math.rsqrt %9 : vector<8x1xf32>
    %11 = vector.broadcast %10 : vector<8x1xf32> to vector<8x64xf32>
    %12 = arith.mulf %2, %11 : vector<8x64xf32>
    %c0_4 = arith.constant 0 : index
    %c0_5 = arith.constant 0 : index
    %13 = vector.load %arg2[%c0_4, %c0_5] : memref<1x64xf32, #tpu.memory_space<vmem>>, vector<1x64xf32>
    %14 = vector.broadcast %13 : vector<1x64xf32> to vector<8x64xf32>
    %15 = arith.mulf %12, %14 : vector<8x64xf32>
    %16 = arith.truncf %15 : vector<8x64xf32> to vector<8x64xbf16>
    %c0_6 = arith.constant 0 : index
    %c0_7 = arith.constant 0 : index
    %17 = vector.load %arg3[%c0_6, %c0_7] : memref<64x256xbf16, #tpu.memory_space<vmem>>, vector<64x256xbf16>
    %cst_8 = arith.constant dense<0.000000e+00> : vector<8x256xf32>
    %18 = tpu.matmul %16, %17, %cst_8 {dimension_numbers = #tpu.dot_dimension_numbers<[1], [0], [0], [1], [0, 0, 1, 1], [], []>} : vector<8x64xbf16>, vector<64x256xbf16>, vector<8x256xf32> -> vector<8x256xf32>
    %c0_9 = arith.constant 0 : index
    %c0_10 = arith.constant 0 : index
    %c0_11 = arith.constant 0 : index
    %19 = vector.load %arg4[%c0_9, %c0_10, %c0_11] : memref<1x8x256xf32, #tpu.memory_space<vmem>>, vector<1x8x256xf32>
    %20 = vector.shape_cast %19 : vector<1x8x256xf32> to vector<8x256xf32>
    %21 = vector.shape_cast %18 : vector<8x256xf32> to vector<1x8x256xf32>
    tpu.vector_store %arg4[%c0_9, %c0_10, %c0_11], %21 {strides = array<i32>} : memref<1x8x256xf32, #tpu.memory_space<vmem>>, vector<1x8x256xf32>,
    return
  }
  func.func @transform_0(%arg0: i32) -> (i32, i32, i32) {
    %c0_i32 = arith.constant 0 : i32
    %c0_i32_0 = arith.constant 0 : i32
    %c0_i32_1 = arith.constant 0 : i32
    return %arg0, %c0_i32, %c0_i32_0 : i32, i32, i32
  }
  func.func @transform_1(%arg0: i32) -> (i32, i32) {
    %c0_i32 = arith.constant 0 : i32
    %c0_i32_0 = arith.constant 0 : i32
    %c0_i32_1 = arith.constant 0 : i32
    return %c0_i32, %c0_i32_0 : i32, i32
  }
  func.func @transform_2(%arg0: i32) -> (i32, i32) {
    %c0_i32 = arith.constant 0 : i32
    %c0_i32_0 = arith.constant 0 : i32
    %c0_i32_1 = arith.constant 0 : i32
    return %c0_i32, %c0_i32_0 : i32, i32
  }
  func.func @transform_3(%arg0: i32) -> (i32, i32, i32) {
    %c0_i32 = arith.constant 0 : i32
    %c0_i32_0 = arith.constant 0 : i32
    %c0_i32_1 = arith.constant 0 : i32
    return %arg0, %c0_i32, %c0_i32_0 : i32, i32, i32
  }
}

module attributes {stable_mosaic.version = 11 : i64} {
  func.func @_layer_kernel(%arg0: i32, %arg1: memref<1x8x64xbf16, #tpu.memory_space<vmem>>, %arg2: memref<1x1x8xf32, #tpu.memory_space<vmem>>, %arg3: memref<8x64xf32, #tpu.memory_space<vmem>>, %arg4: memref<8x64xf32, #tpu.memory_space<vmem>>, %arg5: memref<64x64xbf16, #tpu.memory_space<vmem>>, %arg6: memref<32x32xbf16, #tpu.memory_space<vmem>>, %arg7: memref<1x64xf32, #tpu.memory_space<vmem>>, %arg8: memref<64x128xbf16, #tpu.memory_space<vmem>>, %arg9: memref<64x24xbf16, #tpu.memory_space<vmem>>, %arg10: memref<24x128xbf16, #tpu.memory_space<vmem>>, %arg11: memref<1x128xf32, #tpu.memory_space<vmem>>, %arg12: memref<64x64xbf16, #tpu.memory_space<vmem>>, %arg13: memref<64x8xbf16, #tpu.memory_space<vmem>>, %arg14: memref<8x64xbf16, #tpu.memory_space<vmem>>, %arg15: memref<1x64xf32, #tpu.memory_space<vmem>>, %arg16: memref<64x256xbf16, #tpu.memory_space<vmem>>, %arg17: memref<64x16xbf16, #tpu.memory_space<vmem>>, %arg18: memref<16x256xbf16, #tpu.memory_space<vmem>>, %arg19: memref<128x64xbf16, #tpu.memory_space<vmem>>, %arg20: memref<128x8xbf16, #tpu.memory_space<vmem>>, %arg21: memref<8x64xbf16, #tpu.memory_space<vmem>>, %arg22: memref<1x8x64xbf16, #tpu.memory_space<vmem>>) attributes {dimension_semantics = [#tpu.dimension_semantics<parallel>], iteration_bounds = array<i64: 2>, scalar_prefetch = 0 : i64, scratch_operands = 0 : i64, tpu.core_type = #tpu.core_type<tc>, window_params = [{transform_indices = @transform_0, window_bounds = array<i64: 1, 8, 64>}, {transform_indices = @transform_1, window_bounds = array<i64: 1, 1, 8>}, {pipeline_mode = #tpu.pipeline_mode<synchronous>, transform_indices = @transform_2, window_bounds = array<i64: 8, 64>}, {pipeline_mode = #tpu.pipeline_mode<synchronous>, transform_indices = @transform_3, window_bounds = array<i64: 8, 64>}, {pipeline_mode = #tpu.pipeline_mode<synchronous>, transform_indices = @transform_4, window_bounds = array<i64: 64, 64>}, {pipeline_mode = #tpu.pipeline_mode<synchronous>, transform_indices = @transform_5, window_bounds = array<i64: 32, 32>}, {pipeline_mode = #tpu.pipeline_mode<synchronous>, transform_indices = @transform_6, window_bounds = array<i64: 1, 64>}, {pipeline_mode = #tpu.pipeline_mode<synchronous>, transform_indices = @transform_7, window_bounds = array<i64: 64, 128>}, {pipeline_mode = #tpu.pipeline_mode<synchronous>, transform_indices = @transform_8, window_bounds = array<i64: 64, 24>}, {pipeline_mode = #tpu.pipeline_mode<synchronous>, transform_indices = @transform_9, window_bounds = array<i64: 24, 128>}, {pipeline_mode = #tpu.pipeline_mode<synchronous>, transform_indices = @transform_10, window_bounds = array<i64: 1, 128>}, {pipeline_mode = #tpu.pipeline_mode<synchronous>, transform_indices = @transform_11, window_bounds = array<i64: 64, 64>}, {pipeline_mode = #tpu.pipeline_mode<synchronous>, transform_indices = @transform_12, window_bounds = array<i64: 64, 8>}, {pipeline_mode = #tpu.pipeline_mode<synchronous>, transform_indices = @transform_13, window_bounds = array<i64: 8, 64>}, {pipeline_mode = #tpu.pipeline_mode<synchronous>, transform_indices = @transform_14, window_bounds = array<i64: 1, 64>}, {pipeline_mode = #tpu.pipeline_mode<synchronous>, transform_indices = @transform_15, window_bounds = array<i64: 64, 256>}, {pipeline_mode = #tpu.pipeline_mode<synchronous>, transform_indices = @transform_16, window_bounds = array<i64: 64, 16>}, {pipeline_mode = #tpu.pipeline_mode<synchronous>, transform_indices = @transform_17, window_bounds = array<i64: 16, 256>}, {pipeline_mode = #tpu.pipeline_mode<synchronous>, transform_indices = @transform_18, window_bounds = array<i64: 128, 64>}, {pipeline_mode = #tpu.pipeline_mode<synchronous>, transform_indices = @transform_19, window_bounds = array<i64: 128, 8>}, {pipeline_mode = #tpu.pipeline_mode<synchronous>, transform_indices = @transform_20, window_bounds = array<i64: 8, 64>}, {transform_indices = @transform_21, window_bounds = array<i64: 1, 8, 64>}]} {
    %c0 = arith.constant 0 : index
    %c0_0 = arith.constant 0 : index
    %c0_1 = arith.constant 0 : index
    %0 = vector.load %arg1[%c0, %c0_0, %c0_1] : memref<1x8x64xbf16, #tpu.memory_space<vmem>>, vector<1x8x64xbf16>
    %1 = vector.shape_cast %0 : vector<1x8x64xbf16> to vector<8x64xbf16>
    %2 = arith.extf %1 : vector<8x64xbf16> to vector<8x64xf32>
    %c0_2 = arith.constant 0 : index
    %c0_3 = arith.constant 0 : index
    %3 = vector.load %arg7[%c0_2, %c0_3] : memref<1x64xf32, #tpu.memory_space<vmem>>, vector<1x64xf32>
    %4 = arith.mulf %2, %2 : vector<8x64xf32>
    %cst = arith.constant dense<0.000000e+00> : vector<8xf32>
    %5 = vector.multi_reduction <add>, %4, %cst [1] : vector<8x64xf32> to vector<8xf32>
    %6 = vector.shape_cast %5 : vector<8xf32> to vector<8x1xf32>
    %cst_4 = arith.constant 6.400000e+01 : f32
    %7 = vector.broadcast %cst_4 : f32 to vector<8x1xf32>
    %8 = arith.divf %6, %7 : vector<8x1xf32>
    %cst_5 = arith.constant 9.99999997E-7 : f32
    %9 = vector.broadcast %cst_5 : f32 to vector<8x1xf32>
    %10 = arith.addf %8, %9 : vector<8x1xf32>
    %11 = math.rsqrt %10 : vector<8x1xf32>
    %12 = vector.broadcast %11 : vector<8x1xf32> to vector<8x64xf32>
    %13 = arith.mulf %2, %12 : vector<8x64xf32>
    %14 = vector.broadcast %3 : vector<1x64xf32> to vector<8x64xf32>
    %15 = arith.mulf %13, %14 : vector<8x64xf32>
    %16 = arith.truncf %15 : vector<8x64xf32> to vector<8x64xbf16>
    %c0_6 = arith.constant 0 : index
    %c0_7 = arith.constant 0 : index
    %17 = vector.load %arg8[%c0_6, %c0_7] : memref<64x128xbf16, #tpu.memory_space<vmem>>, vector<64x128xbf16>
    %cst_8 = arith.constant dense<0.000000e+00> : vector<8x128xf32>
    %18 = tpu.matmul %16, %17, %cst_8 {dimension_numbers = #tpu.dot_dimension_numbers<[1], [0], [0], [1], [0, 0, 1, 1], [], []>} : vector<8x64xbf16>, vector<64x128xbf16>, vector<8x128xf32> -> vector<8x128xf32>
    %c0_9 = arith.constant 0 : index
    %c0_10 = arith.constant 0 : index
    %19 = vector.load %arg9[%c0_9, %c0_10] : memref<64x24xbf16, #tpu.memory_space<vmem>>, vector<64x24xbf16>
    %cst_11 = arith.constant dense<0.000000e+00> : vector<8x24xf32>
    %20 = tpu.matmul %16, %19, %cst_11 {dimension_numbers = #tpu.dot_dimension_numbers<[1], [0], [0], [1], [0, 0, 1, 1], [], []>} : vector<8x64xbf16>, vector<64x24xbf16>, vector<8x24xf32> -> vector<8x24xf32>
    %21 = arith.truncf %20 : vector<8x24xf32> to vector<8x24xbf16>
    %c0_12 = arith.constant 0 : index
    %c0_13 = arith.constant 0 : index
    %22 = vector.load %arg10[%c0_12, %c0_13] : memref<24x128xbf16, #tpu.memory_space<vmem>>, vector<24x128xbf16>
    %cst_14 = arith.constant dense<0.000000e+00> : vector<8x128xf32>
    %23 = tpu.matmul %21, %22, %cst_14 {dimension_numbers = #tpu.dot_dimension_numbers<[1], [0], [0], [1], [0, 0, 1, 1], [], []>} : vector<8x24xbf16>, vector<24x128xbf16>, vector<8x128xf32> -> vector<8x128xf32>
    %24 = arith.addf %18, %23 : vector<8x128xf32>
    %c0_15 = arith.constant 0 : index
    %c0_16 = arith.constant 0 : index
    %25 = vector.load %arg11[%c0_15, %c0_16] : memref<1x128xf32, #tpu.memory_space<vmem>>, vector<1x128xf32>
    %26 = vector.broadcast %25 : vector<1x128xf32> to vector<8x128xf32>
    %27 = arith.addf %24, %26 : vector<8x128xf32>
    %28 = vector.extract_strided_slice %27 {offsets = [0, 0], sizes = [8, 64], strides = [1, 1]} : vector<8x128xf32> to vector<8x64xf32>
    %29 = vector.extract_strided_slice %27 {offsets = [0, 64], sizes = [8, 32], strides = [1, 1]} : vector<8x128xf32> to vector<8x32xf32>
    %30 = vector.extract_strided_slice %27 {offsets = [0, 96], sizes = [8, 32], strides = [1, 1]} : vector<8x128xf32> to vector<8x32xf32>
    %c0_17 = arith.constant 0 : index
    %c0_18 = arith.constant 0 : index
    %31 = vector.load %arg3[%c0_17, %c0_18] : memref<8x64xf32, #tpu.memory_space<vmem>>, vector<8x64xf32>
    %c0_19 = arith.constant 0 : index
    %c0_20 = arith.constant 0 : index
    %32 = vector.load %arg4[%c0_19, %c0_20] : memref<8x64xf32, #tpu.memory_space<vmem>>, vector<8x64xf32>
    %33 = arith.mulf %28, %31 : vector<8x64xf32>
    %34 = arith.truncf %28 : vector<8x64xf32> to vector<8x64xbf16>
    %c0_21 = arith.constant 0 : index
    %c0_22 = arith.constant 0 : index
    %35 = vector.load %arg5[%c0_21, %c0_22] : memref<64x64xbf16, #tpu.memory_space<vmem>>, vector<64x64xbf16>
    %cst_23 = arith.constant dense<0.000000e+00> : vector<8x64xf32>
    %36 = tpu.matmul %34, %35, %cst_23 {dimension_numbers = #tpu.dot_dimension_numbers<[1], [0], [0], [1], [0, 0, 1, 1], [], []>} : vector<8x64xbf16>, vector<64x64xbf16>, vector<8x64xf32> -> vector<8x64xf32>
    %37 = arith.mulf %36, %32 : vector<8x64xf32>
    %38 = arith.addf %33, %37 : vector<8x64xf32>
    %39 = vector.extract_strided_slice %31 {offsets = [0, 0], sizes = [8, 32], strides = [1, 1]} : vector<8x64xf32> to vector<8x32xf32>
    %40 = arith.mulf %29, %39 : vector<8x32xf32>
    %41 = arith.truncf %29 : vector<8x32xf32> to vector<8x32xbf16>
    %c0_24 = arith.constant 0 : index
    %c0_25 = arith.constant 0 : index
    %42 = vector.load %arg6[%c0_24, %c0_25] : memref<32x32xbf16, #tpu.memory_space<vmem>>, vector<32x32xbf16>
    %cst_26 = arith.constant dense<0.000000e+00> : vector<8x32xf32>
    %43 = tpu.matmul %41, %42, %cst_26 {dimension_numbers = #tpu.dot_dimension_numbers<[1], [0], [0], [1], [0, 0, 1, 1], [], []>} : vector<8x32xbf16>, vector<32x32xbf16>, vector<8x32xf32> -> vector<8x32xf32>
    %44 = vector.extract_strided_slice %32 {offsets = [0, 0], sizes = [8, 32], strides = [1, 1]} : vector<8x64xf32> to vector<8x32xf32>
    %45 = arith.mulf %43, %44 : vector<8x32xf32>
    %46 = arith.addf %40, %45 : vector<8x32xf32>
    %c0_27 = arith.constant 0 : index
    %c0_28 = arith.constant 0 : index
    %c0_29 = arith.constant 0 : index
    %47 = vector.load %arg2[%c0_27, %c0_28, %c0_29] : memref<1x1x8xf32, #tpu.memory_space<vmem>>, vector<1x1x8xf32>
    %48 = vector.shape_cast %47 : vector<1x1x8xf32> to vector<1x8xf32>
    %49 = tpu.iota {dimensions = array<i32: 0>} : vector<8x8xi32>
    %50 = tpu.iota {dimensions = array<i32: 1>} : vector<8x8xi32>
    %51 = arith.cmpi sle, %50, %49 : vector<8x8xi32>
    %cst_30 = arith.constant 0.000000e+00 : f32
    %52 = vector.broadcast %cst_30 : f32 to vector<1x8xf32>
    %53 = arith.cmpf ogt, %48, %52 : vector<1x8xf32>
    %54 = vector.broadcast %53 : vector<1x8xi1> to vector<8x8xi1>
    %55 = arith.andi %51, %54 : vector<8x8xi1>
    %cst_31 = arith.constant 0.000000e+00 : f32
    %cst_32 = arith.constant -1.000000e+09 : f32
    %56 = vector.broadcast %cst_31 : f32 to vector<8x8xf32>
    %57 = vector.broadcast %cst_32 : f32 to vector<8x8xf32>
    %58 = arith.select %55, %56, %57 : vector<8x8xi1>, vector<8x8xf32>
    %59 = vector.extract_strided_slice %38 {offsets = [0, 0], sizes = [8, 16], strides = [1, 1]} : vector<8x64xf32> to vector<8x16xf32>
    %60 = arith.truncf %59 : vector<8x16xf32> to vector<8x16xbf16>
    %61 = vector.extract_strided_slice %46 {offsets = [0, 0], sizes = [8, 16], strides = [1, 1]} : vector<8x32xf32> to vector<8x16xf32>
    %62 = arith.truncf %61 : vector<8x16xf32> to vector<8x16xbf16>
    %63 = vector.extract_strided_slice %30 {offsets = [0, 0], sizes = [8, 16], strides = [1, 1]} : vector<8x32xf32> to vector<8x16xf32>
    %64 = arith.truncf %63 : vector<8x16xf32> to vector<8x16xbf16>
    %cst_33 = arith.constant dense<0.000000e+00> : vector<8x8xf32>
    %65 = tpu.matmul %60, %62, %cst_33 {dimension_numbers = #tpu.dot_dimension_numbers<[1], [1], [0], [0], [0, 0, 1, 0], [], []>} : vector<8x16xbf16>, vector<8x16xbf16>, vector<8x8xf32> -> vector<8x8xf32>
    %cst_34 = arith.constant 2.500000e-01 : f32
    %66 = vector.broadcast %cst_34 : f32 to vector<8x8xf32>
    %67 = arith.mulf %65, %66 : vector<8x8xf32>
    %68 = arith.addf %67, %58 : vector<8x8xf32>
    %cst_35 = arith.constant dense<0xFF800000> : vector<8xf32>
    %69 = vector.multi_reduction <maximumf>, %68, %cst_35 [1] : vector<8x8xf32> to vector<8xf32>
    %70 = vector.shape_cast %69 : vector<8xf32> to vector<8x1xf32>
    %71 = vector.broadcast %70 : vector<8x1xf32> to vector<8x8xf32>
    %72 = arith.subf %68, %71 : vector<8x8xf32>
    %73 = math.exp %72 : vector<8x8xf32>
    %cst_36 = arith.constant dense<0.000000e+00> : vector<8xf32>
    %74 = vector.multi_reduction <add>, %73, %cst_36 [1] : vector<8x8xf32> to vector<8xf32>
    %75 = vector.shape_cast %74 : vector<8xf32> to vector<8x1xf32>
    %76 = tpu.reciprocal %75 {approx = true} : vector<8x1xf32> -> vector<8x1xf32>
    %77 = vector.broadcast %76 : vector<8x1xf32> to vector<8x8xf32>
    %78 = arith.mulf %73, %77 : vector<8x8xf32>
    %79 = arith.truncf %78 : vector<8x8xf32> to vector<8x8xbf16>
    %cst_37 = arith.constant dense<0.000000e+00> : vector<8x16xf32>
    %80 = tpu.matmul %79, %64, %cst_37 {dimension_numbers = #tpu.dot_dimension_numbers<[1], [0], [0], [1], [0, 0, 1, 1], [], []>} : vector<8x8xbf16>, vector<8x16xbf16>, vector<8x16xf32> -> vector<8x16xf32>
    %81 = vector.extract_strided_slice %38 {offsets = [0, 16], sizes = [8, 16], strides = [1, 1]} : vector<8x64xf32> to vector<8x16xf32>
    %82 = arith.truncf %81 : vector<8x16xf32> to vector<8x16xbf16>
    %83 = vector.extract_strided_slice %46 {offsets = [0, 0], sizes = [8, 16], strides = [1, 1]} : vector<8x32xf32> to vector<8x16xf32>
    %84 = arith.truncf %83 : vector<8x16xf32> to vector<8x16xbf16>
    %85 = vector.extract_strided_slice %30 {offsets = [0, 0], sizes = [8, 16], strides = [1, 1]} : vector<8x32xf32> to vector<8x16xf32>
    %86 = arith.truncf %85 : vector<8x16xf32> to vector<8x16xbf16>
    %cst_38 = arith.constant dense<0.000000e+00> : vector<8x8xf32>
    %87 = tpu.matmul %82, %84, %cst_38 {dimension_numbers = #tpu.dot_dimension_numbers<[1], [1], [0], [0], [0, 0, 1, 0], [], []>} : vector<8x16xbf16>, vector<8x16xbf16>, vector<8x8xf32> -> vector<8x8xf32>
    %cst_39 = arith.constant 2.500000e-01 : f32
    %88 = vector.broadcast %cst_39 : f32 to vector<8x8xf32>
    %89 = arith.mulf %87, %88 : vector<8x8xf32>
    %90 = arith.addf %89, %58 : vector<8x8xf32>
    %cst_40 = arith.constant dense<0xFF800000> : vector<8xf32>
    %91 = vector.multi_reduction <maximumf>, %90, %cst_40 [1] : vector<8x8xf32> to vector<8xf32>
    %92 = vector.shape_cast %91 : vector<8xf32> to vector<8x1xf32>
    %93 = vector.broadcast %92 : vector<8x1xf32> to vector<8x8xf32>
    %94 = arith.subf %90, %93 : vector<8x8xf32>
    %95 = math.exp %94 : vector<8x8xf32>
    %cst_41 = arith.constant dense<0.000000e+00> : vector<8xf32>
    %96 = vector.multi_reduction <add>, %95, %cst_41 [1] : vector<8x8xf32> to vector<8xf32>
    %97 = vector.shape_cast %96 : vector<8xf32> to vector<8x1xf32>
    %98 = tpu.reciprocal %97 {approx = true} : vector<8x1xf32> -> vector<8x1xf32>
    %99 = vector.broadcast %98 : vector<8x1xf32> to vector<8x8xf32>
    %100 = arith.mulf %95, %99 : vector<8x8xf32>
    %101 = arith.truncf %100 : vector<8x8xf32> to vector<8x8xbf16>
    %cst_42 = arith.constant dense<0.000000e+00> : vector<8x16xf32>
    %102 = tpu.matmul %101, %86, %cst_42 {dimension_numbers = #tpu.dot_dimension_numbers<[1], [0], [0], [1], [0, 0, 1, 1], [], []>} : vector<8x8xbf16>, vector<8x16xbf16>, vector<8x16xf32> -> vector<8x16xf32>
    %103 = vector.extract_strided_slice %38 {offsets = [0, 32], sizes = [8, 16], strides = [1, 1]} : vector<8x64xf32> to vector<8x16xf32>
    %104 = arith.truncf %103 : vector<8x16xf32> to vector<8x16xbf16>
    %105 = vector.extract_strided_slice %46 {offsets = [0, 16], sizes = [8, 16], strides = [1, 1]} : vector<8x32xf32> to vector<8x16xf32>
    %106 = arith.truncf %105 : vector<8x16xf32> to vector<8x16xbf16>
    %107 = vector.extract_strided_slice %30 {offsets = [0, 16], sizes = [8, 16], strides = [1, 1]} : vector<8x32xf32> to vector<8x16xf32>
    %108 = arith.truncf %107 : vector<8x16xf32> to vector<8x16xbf16>
    %cst_43 = arith.constant dense<0.000000e+00> : vector<8x8xf32>
    %109 = tpu.matmul %104, %106, %cst_43 {dimension_numbers = #tpu.dot_dimension_numbers<[1], [1], [0], [0], [0, 0, 1, 0], [], []>} : vector<8x16xbf16>, vector<8x16xbf16>, vector<8x8xf32> -> vector<8x8xf32>
    %cst_44 = arith.constant 2.500000e-01 : f32
    %110 = vector.broadcast %cst_44 : f32 to vector<8x8xf32>
    %111 = arith.mulf %109, %110 : vector<8x8xf32>
    %112 = arith.addf %111, %58 : vector<8x8xf32>
    %cst_45 = arith.constant dense<0xFF800000> : vector<8xf32>
    %113 = vector.multi_reduction <maximumf>, %112, %cst_45 [1] : vector<8x8xf32> to vector<8xf32>
    %114 = vector.shape_cast %113 : vector<8xf32> to vector<8x1xf32>
    %115 = vector.broadcast %114 : vector<8x1xf32> to vector<8x8xf32>
    %116 = arith.subf %112, %115 : vector<8x8xf32>
    %117 = math.exp %116 : vector<8x8xf32>
    %cst_46 = arith.constant dense<0.000000e+00> : vector<8xf32>
    %118 = vector.multi_reduction <add>, %117, %cst_46 [1] : vector<8x8xf32> to vector<8xf32>
    %119 = vector.shape_cast %118 : vector<8xf32> to vector<8x1xf32>
    %120 = tpu.reciprocal %119 {approx = true} : vector<8x1xf32> -> vector<8x1xf32>
    %121 = vector.broadcast %120 : vector<8x1xf32> to vector<8x8xf32>
    %122 = arith.mulf %117, %121 : vector<8x8xf32>
    %123 = arith.truncf %122 : vector<8x8xf32> to vector<8x8xbf16>
    %cst_47 = arith.constant dense<0.000000e+00> : vector<8x16xf32>
    %124 = tpu.matmul %123, %108, %cst_47 {dimension_numbers = #tpu.dot_dimension_numbers<[1], [0], [0], [1], [0, 0, 1, 1], [], []>} : vector<8x8xbf16>, vector<8x16xbf16>, vector<8x16xf32> -> vector<8x16xf32>
    %125 = vector.extract_strided_slice %38 {offsets = [0, 48], sizes = [8, 16], strides = [1, 1]} : vector<8x64xf32> to vector<8x16xf32>
    %126 = arith.truncf %125 : vector<8x16xf32> to vector<8x16xbf16>
    %127 = vector.extract_strided_slice %46 {offsets = [0, 16], sizes = [8, 16], strides = [1, 1]} : vector<8x32xf32> to vector<8x16xf32>
    %128 = arith.truncf %127 : vector<8x16xf32> to vector<8x16xbf16>
    %129 = vector.extract_strided_slice %30 {offsets = [0, 16], sizes = [8, 16], strides = [1, 1]} : vector<8x32xf32> to vector<8x16xf32>
    %130 = arith.truncf %129 : vector<8x16xf32> to vector<8x16xbf16>
    %cst_48 = arith.constant dense<0.000000e+00> : vector<8x8xf32>
    %131 = tpu.matmul %126, %128, %cst_48 {dimension_numbers = #tpu.dot_dimension_numbers<[1], [1], [0], [0], [0, 0, 1, 0], [], []>} : vector<8x16xbf16>, vector<8x16xbf16>, vector<8x8xf32> -> vector<8x8xf32>
    %cst_49 = arith.constant 2.500000e-01 : f32
    %132 = vector.broadcast %cst_49 : f32 to vector<8x8xf32>
    %133 = arith.mulf %131, %132 : vector<8x8xf32>
    %134 = arith.addf %133, %58 : vector<8x8xf32>
    %cst_50 = arith.constant dense<0xFF800000> : vector<8xf32>
    %135 = vector.multi_reduction <maximumf>, %134, %cst_50 [1] : vector<8x8xf32> to vector<8xf32>
    %136 = vector.shape_cast %135 : vector<8xf32> to vector<8x1xf32>
    %137 = vector.broadcast %136 : vector<8x1xf32> to vector<8x8xf32>
    %138 = arith.subf %134, %137 : vector<8x8xf32>
    %139 = math.exp %138 : vector<8x8xf32>
    %cst_51 = arith.constant dense<0.000000e+00> : vector<8xf32>
    %140 = vector.multi_reduction <add>, %139, %cst_51 [1] : vector<8x8xf32> to vector<8xf32>
    %141 = vector.shape_cast %140 : vector<8xf32> to vector<8x1xf32>
    %142 = tpu.reciprocal %141 {approx = true} : vector<8x1xf32> -> vector<8x1xf32>
    %143 = vector.broadcast %142 : vector<8x1xf32> to vector<8x8xf32>
    %144 = arith.mulf %139, %143 : vector<8x8xf32>
    %145 = arith.truncf %144 : vector<8x8xf32> to vector<8x8xbf16>
    %cst_52 = arith.constant dense<0.000000e+00> : vector<8x16xf32>
    %146 = tpu.matmul %145, %130, %cst_52 {dimension_numbers = #tpu.dot_dimension_numbers<[1], [0], [0], [1], [0, 0, 1, 1], [], []>} : vector<8x8xbf16>, vector<8x16xbf16>, vector<8x16xf32> -> vector<8x16xf32>
    %147 = tpu.concatenate %80, %102, %124, %146 in 1 : vector<8x16xf32>, vector<8x16xf32>, vector<8x16xf32>, vector<8x16xf32> -> vector<8x64xf32>
    %148 = arith.truncf %147 : vector<8x64xf32> to vector<8x64xbf16>
    %c0_53 = arith.constant 0 : index
    %c0_54 = arith.constant 0 : index
    %149 = vector.load %arg12[%c0_53, %c0_54] : memref<64x64xbf16, #tpu.memory_space<vmem>>, vector<64x64xbf16>
    %cst_55 = arith.constant dense<0.000000e+00> : vector<8x64xf32>
    %150 = tpu.matmul %148, %149, %cst_55 {dimension_numbers = #tpu.dot_dimension_numbers<[1], [0], [0], [1], [0, 0, 1, 1], [], []>} : vector<8x64xbf16>, vector<64x64xbf16>, vector<8x64xf32> -> vector<8x64xf32>
    %c0_56 = arith.constant 0 : index
    %c0_57 = arith.constant 0 : index
    %151 = vector.load %arg13[%c0_56, %c0_57] : memref<64x8xbf16, #tpu.memory_space<vmem>>, vector<64x8xbf16>
    %cst_58 = arith.constant dense<0.000000e+00> : vector<8x8xf32>
    %152 = tpu.matmul %148, %151, %cst_58 {dimension_numbers = #tpu.dot_dimension_numbers<[1], [0], [0], [1], [0, 0, 1, 1], [], []>} : vector<8x64xbf16>, vector<64x8xbf16>, vector<8x8xf32> -> vector<8x8xf32>
    %153 = arith.truncf %152 : vector<8x8xf32> to vector<8x8xbf16>
    %c0_59 = arith.constant 0 : index
    %c0_60 = arith.constant 0 : index
    %154 = vector.load %arg14[%c0_59, %c0_60] : memref<8x64xbf16, #tpu.memory_space<vmem>>, vector<8x64xbf16>
    %cst_61 = arith.constant dense<0.000000e+00> : vector<8x64xf32>
    %155 = tpu.matmul %153, %154, %cst_61 {dimension_numbers = #tpu.dot_dimension_numbers<[1], [0], [0], [1], [0, 0, 1, 1], [], []>} : vector<8x8xbf16>, vector<8x64xbf16>, vector<8x64xf32> -> vector<8x64xf32>
    %156 = arith.addf %150, %155 : vector<8x64xf32>
    %157 = arith.addf %2, %156 : vector<8x64xf32>
    %c0_62 = arith.constant 0 : index
    %c0_63 = arith.constant 0 : index
    %158 = vector.load %arg15[%c0_62, %c0_63] : memref<1x64xf32, #tpu.memory_space<vmem>>, vector<1x64xf32>
    %159 = arith.mulf %157, %157 : vector<8x64xf32>
    %cst_64 = arith.constant dense<0.000000e+00> : vector<8xf32>
    %160 = vector.multi_reduction <add>, %159, %cst_64 [1] : vector<8x64xf32> to vector<8xf32>
    %161 = vector.shape_cast %160 : vector<8xf32> to vector<8x1xf32>
    %cst_65 = arith.constant 6.400000e+01 : f32
    %162 = vector.broadcast %cst_65 : f32 to vector<8x1xf32>
    %163 = arith.divf %161, %162 : vector<8x1xf32>
    %cst_66 = arith.constant 9.99999997E-7 : f32
    %164 = vector.broadcast %cst_66 : f32 to vector<8x1xf32>
    %165 = arith.addf %163, %164 : vector<8x1xf32>
    %166 = math.rsqrt %165 : vector<8x1xf32>
    %167 = vector.broadcast %166 : vector<8x1xf32> to vector<8x64xf32>
    %168 = arith.mulf %157, %167 : vector<8x64xf32>
    %169 = vector.broadcast %158 : vector<1x64xf32> to vector<8x64xf32>
    %170 = arith.mulf %168, %169 : vector<8x64xf32>
    %171 = arith.truncf %170 : vector<8x64xf32> to vector<8x64xbf16>
    %c0_67 = arith.constant 0 : index
    %c0_68 = arith.constant 0 : index
    %172 = vector.load %arg16[%c0_67, %c0_68] : memref<64x256xbf16, #tpu.memory_space<vmem>>, vector<64x256xbf16>
    %cst_69 = arith.constant dense<0.000000e+00> : vector<8x256xf32>
    %173 = tpu.matmul %171, %172, %cst_69 {dimension_numbers = #tpu.dot_dimension_numbers<[1], [0], [0], [1], [0, 0, 1, 1], [], []>} : vector<8x64xbf16>, vector<64x256xbf16>, vector<8x256xf32> -> vector<8x256xf32>
    %c0_70 = arith.constant 0 : index
    %c0_71 = arith.constant 0 : index
    %174 = vector.load %arg17[%c0_70, %c0_71] : memref<64x16xbf16, #tpu.memory_space<vmem>>, vector<64x16xbf16>
    %cst_72 = arith.constant dense<0.000000e+00> : vector<8x16xf32>
    %175 = tpu.matmul %171, %174, %cst_72 {dimension_numbers = #tpu.dot_dimension_numbers<[1], [0], [0], [1], [0, 0, 1, 1], [], []>} : vector<8x64xbf16>, vector<64x16xbf16>, vector<8x16xf32> -> vector<8x16xf32>
    %176 = arith.truncf %175 : vector<8x16xf32> to vector<8x16xbf16>
    %c0_73 = arith.constant 0 : index
    %c0_74 = arith.constant 0 : index
    %177 = vector.load %arg18[%c0_73, %c0_74] : memref<16x256xbf16, #tpu.memory_space<vmem>>, vector<16x256xbf16>
    %cst_75 = arith.constant dense<0.000000e+00> : vector<8x256xf32>
    %178 = tpu.matmul %176, %177, %cst_75 {dimension_numbers = #tpu.dot_dimension_numbers<[1], [0], [0], [1], [0, 0, 1, 1], [], []>} : vector<8x16xbf16>, vector<16x256xbf16>, vector<8x256xf32> -> vector<8x256xf32>
    %179 = arith.addf %173, %178 : vector<8x256xf32>
    %180 = vector.extract_strided_slice %179 {offsets = [0, 0], sizes = [8, 128], strides = [1, 1]} : vector<8x256xf32> to vector<8x128xf32>
    %181 = vector.extract_strided_slice %179 {offsets = [0, 128], sizes = [8, 128], strides = [1, 1]} : vector<8x256xf32> to vector<8x128xf32>
    %182 = arith.negf %180 : vector<8x128xf32>
    %183 = math.exp %182 : vector<8x128xf32>
    %cst_76 = arith.constant 1.000000e+00 : f32
    %184 = vector.broadcast %cst_76 : f32 to vector<8x128xf32>
    %185 = arith.addf %184, %183 : vector<8x128xf32>
    %186 = arith.divf %184, %185 : vector<8x128xf32>
    %187 = arith.mulf %180, %186 : vector<8x128xf32>
    %188 = arith.mulf %187, %181 : vector<8x128xf32>
    %189 = arith.truncf %188 : vector<8x128xf32> to vector<8x128xbf16>
    %c0_77 = arith.constant 0 : index
    %c0_78 = arith.constant 0 : index
    %190 = vector.load %arg19[%c0_77, %c0_78] : memref<128x64xbf16, #tpu.memory_space<vmem>>, vector<128x64xbf16>
    %cst_79 = arith.constant dense<0.000000e+00> : vector<8x64xf32>
    %191 = tpu.matmul %189, %190, %cst_79 {dimension_numbers = #tpu.dot_dimension_numbers<[1], [0], [0], [1], [0, 0, 1, 1], [], []>} : vector<8x128xbf16>, vector<128x64xbf16>, vector<8x64xf32> -> vector<8x64xf32>
    %c0_80 = arith.constant 0 : index
    %c0_81 = arith.constant 0 : index
    %192 = vector.load %arg20[%c0_80, %c0_81] : memref<128x8xbf16, #tpu.memory_space<vmem>>, vector<128x8xbf16>
    %cst_82 = arith.constant dense<0.000000e+00> : vector<8x8xf32>
    %193 = tpu.matmul %189, %192, %cst_82 {dimension_numbers = #tpu.dot_dimension_numbers<[1], [0], [0], [1], [0, 0, 1, 1], [], []>} : vector<8x128xbf16>, vector<128x8xbf16>, vector<8x8xf32> -> vector<8x8xf32>
    %194 = arith.truncf %193 : vector<8x8xf32> to vector<8x8xbf16>
    %c0_83 = arith.constant 0 : index
    %c0_84 = arith.constant 0 : index
    %195 = vector.load %arg21[%c0_83, %c0_84] : memref<8x64xbf16, #tpu.memory_space<vmem>>, vector<8x64xbf16>
    %cst_85 = arith.constant dense<0.000000e+00> : vector<8x64xf32>
    %196 = tpu.matmul %194, %195, %cst_85 {dimension_numbers = #tpu.dot_dimension_numbers<[1], [0], [0], [1], [0, 0, 1, 1], [], []>} : vector<8x8xbf16>, vector<8x64xbf16>, vector<8x64xf32> -> vector<8x64xf32>
    %197 = arith.addf %191, %196 : vector<8x64xf32>
    %198 = arith.addf %157, %197 : vector<8x64xf32>
    %199 = arith.truncf %198 : vector<8x64xf32> to vector<8x64xbf16>
    %c0_86 = arith.constant 0 : index
    %c0_87 = arith.constant 0 : index
    %c0_88 = arith.constant 0 : index
    %200 = vector.load %arg22[%c0_86, %c0_87, %c0_88] : memref<1x8x64xbf16, #tpu.memory_space<vmem>>, vector<1x8x64xbf16>
    %201 = vector.shape_cast %200 : vector<1x8x64xbf16> to vector<8x64xbf16>
    %202 = vector.shape_cast %199 : vector<8x64xbf16> to vector<1x8x64xbf16>
    tpu.vector_store %arg22[%c0_86, %c0_87, %c0_88], %202 {strides = array<i32>} : memref<1x8x64xbf16, #tpu.memory_space<vmem>>, vector<1x8x64xbf16>,
    return
  }
  func.func @transform_0(%arg0: i32) -> (i32, i32, i32) {
    %c0_i32 = arith.constant 0 : i32
    %c0_i32_0 = arith.constant 0 : i32
    %c0_i32_1 = arith.constant 0 : i32
    return %arg0, %c0_i32, %c0_i32_0 : i32, i32, i32
  }
  func.func @transform_1(%arg0: i32) -> (i32, i32, i32) {
    %c0_i32 = arith.constant 0 : i32
    %c0_i32_0 = arith.constant 0 : i32
    %c0_i32_1 = arith.constant 0 : i32
    return %arg0, %c0_i32, %c0_i32_0 : i32, i32, i32
  }
  func.func @transform_2(%arg0: i32) -> (i32, i32) {
    %c0_i32 = arith.constant 0 : i32
    %c0_i32_0 = arith.constant 0 : i32
    %c0_i32_1 = arith.constant 0 : i32
    return %c0_i32, %c0_i32_0 : i32, i32
  }
  func.func @transform_3(%arg0: i32) -> (i32, i32) {
    %c0_i32 = arith.constant 0 : i32
    %c0_i32_0 = arith.constant 0 : i32
    %c0_i32_1 = arith.constant 0 : i32
    return %c0_i32, %c0_i32_0 : i32, i32
  }
  func.func @transform_4(%arg0: i32) -> (i32, i32) {
    %c0_i32 = arith.constant 0 : i32
    %c0_i32_0 = arith.constant 0 : i32
    %c0_i32_1 = arith.constant 0 : i32
    return %c0_i32, %c0_i32_0 : i32, i32
  }
  func.func @transform_5(%arg0: i32) -> (i32, i32) {
    %c0_i32 = arith.constant 0 : i32
    %c0_i32_0 = arith.constant 0 : i32
    %c0_i32_1 = arith.constant 0 : i32
    return %c0_i32, %c0_i32_0 : i32, i32
  }
  func.func @transform_6(%arg0: i32) -> (i32, i32) {
    %c0_i32 = arith.constant 0 : i32
    %c0_i32_0 = arith.constant 0 : i32
    %c0_i32_1 = arith.constant 0 : i32
    return %c0_i32, %c0_i32_0 : i32, i32
  }
  func.func @transform_7(%arg0: i32) -> (i32, i32) {
    %c0_i32 = arith.constant 0 : i32
    %c0_i32_0 = arith.constant 0 : i32
    %c0_i32_1 = arith.constant 0 : i32
    return %c0_i32, %c0_i32_0 : i32, i32
  }
  func.func @transform_8(%arg0: i32) -> (i32, i32) {
    %c0_i32 = arith.constant 0 : i32
    %c0_i32_0 = arith.constant 0 : i32
    %c0_i32_1 = arith.constant 0 : i32
    return %c0_i32, %c0_i32_0 : i32, i32
  }
  func.func @transform_9(%arg0: i32) -> (i32, i32) {
    %c0_i32 = arith.constant 0 : i32
    %c0_i32_0 = arith.constant 0 : i32
    %c0_i32_1 = arith.constant 0 : i32
    return %c0_i32, %c0_i32_0 : i32, i32
  }
  func.func @transform_10(%arg0: i32) -> (i32, i32) {
    %c0_i32 = arith.constant 0 : i32
    %c0_i32_0 = arith.constant 0 : i32
    %c0_i32_1 = arith.constant 0 : i32
    return %c0_i32, %c0_i32_0 : i32, i32
  }
  func.func @transform_11(%arg0: i32) -> (i32, i32) {
    %c0_i32 = arith.constant 0 : i32
    %c0_i32_0 = arith.constant 0 : i32
    %c0_i32_1 = arith.constant 0 : i32
    return %c0_i32, %c0_i32_0 : i32, i32
  }
  func.func @transform_12(%arg0: i32) -> (i32, i32) {
    %c0_i32 = arith.constant 0 : i32
    %c0_i32_0 = arith.constant 0 : i32
    %c0_i32_1 = arith.constant 0 : i32
    return %c0_i32, %c0_i32_0 : i32, i32
  }
  func.func @transform_13(%arg0: i32) -> (i32, i32) {
    %c0_i32 = arith.constant 0 : i32
    %c0_i32_0 = arith.constant 0 : i32
    %c0_i32_1 = arith.constant 0 : i32
    return %c0_i32, %c0_i32_0 : i32, i32
  }
  func.func @transform_14(%arg0: i32) -> (i32, i32) {
    %c0_i32 = arith.constant 0 : i32
    %c0_i32_0 = arith.constant 0 : i32
    %c0_i32_1 = arith.constant 0 : i32
    return %c0_i32, %c0_i32_0 : i32, i32
  }
  func.func @transform_15(%arg0: i32) -> (i32, i32) {
    %c0_i32 = arith.constant 0 : i32
    %c0_i32_0 = arith.constant 0 : i32
    %c0_i32_1 = arith.constant 0 : i32
    return %c0_i32, %c0_i32_0 : i32, i32
  }
  func.func @transform_16(%arg0: i32) -> (i32, i32) {
    %c0_i32 = arith.constant 0 : i32
    %c0_i32_0 = arith.constant 0 : i32
    %c0_i32_1 = arith.constant 0 : i32
    return %c0_i32, %c0_i32_0 : i32, i32
  }
  func.func @transform_17(%arg0: i32) -> (i32, i32) {
    %c0_i32 = arith.constant 0 : i32
    %c0_i32_0 = arith.constant 0 : i32
    %c0_i32_1 = arith.constant 0 : i32
    return %c0_i32, %c0_i32_0 : i32, i32
  }
  func.func @transform_18(%arg0: i32) -> (i32, i32) {
    %c0_i32 = arith.constant 0 : i32
    %c0_i32_0 = arith.constant 0 : i32
    %c0_i32_1 = arith.constant 0 : i32
    return %c0_i32, %c0_i32_0 : i32, i32
  }
  func.func @transform_19(%arg0: i32) -> (i32, i32) {
    %c0_i32 = arith.constant 0 : i32
    %c0_i32_0 = arith.constant 0 : i32
    %c0_i32_1 = arith.constant 0 : i32
    return %c0_i32, %c0_i32_0 : i32, i32
  }
  func.func @transform_20(%arg0: i32) -> (i32, i32) {
    %c0_i32 = arith.constant 0 : i32
    %c0_i32_0 = arith.constant 0 : i32
    %c0_i32_1 = arith.constant 0 : i32
    return %c0_i32, %c0_i32_0 : i32, i32
  }
  func.func @transform_21(%arg0: i32) -> (i32, i32, i32) {
    %c0_i32 = arith.constant 0 : i32
    %c0_i32_0 = arith.constant 0 : i32
    %c0_i32_1 = arith.constant 0 : i32
    return %arg0, %c0_i32, %c0_i32_0 : i32, i32, i32
  }
}

</mosaic_0001>

<bundles_post_ra>
// kernel: tile.14
= control target key start
LH: loop header
LB: loop body
LE: loop exit
PB: predicated region body
PF: predicated region fallthrough
CT: control target
= control target key end

     0   :  { %vm43_vm0 = vcmask 1047556   ;;  %vm45_vm1 = vcmask 130048   ;;  %s94_s22 = smov 16   ;;  %s95_s25 = smov 32   ;;  %vm55_vm2 = vcmask 523648   ;;  %vm65_vm3 = vcmask 392448   ;;  %s147_s0 = inlined_call_operand.vmem [shape: f32[8,4,16], index: 0, kind: input, shape index: {}]   ;;  %s148_s1 = inlined_call_operand.vmem [shape: f32[8,64], index: 1, kind: output, shape index: {}]  }
   0x1   :  { %v83_v0 = vld [vmem:[%s147_s0 + $0x1c] sm:$0xf]  ;;  %v84_v1 = vld [vmem:[%s147_s0 + $0x18] sm:$0xf]  ;;  %v85_v2 = vld [vmem:[%s147_s0 + $0x14] sm:$0xf] }
   0x2   :  { %9 = vst [vmem:[#allocation0 + $0x38] sm:$0xf] %v83_v0  ;;  %14 = vst [vmem:[#allocation0 + $0x30] sm:$0xf] %v84_v1  ;;  %v86_v3 = vld [vmem:[%s147_s0 + $0x10] sm:$0xf] }
   0x3   :  { %19 = vst [vmem:[#allocation0 + $0x28] sm:$0xf] %v85_v2  ;;  %v87_v4 = vld [vmem:[%s147_s0 + $0xc] sm:$0xf]  ;;  %v88_v5 = vld [vmem:[%s147_s0 + $0x8] sm:$0xf] }
   0x4   :  { %24 = vst [vmem:[#allocation0 + $0x20] sm:$0xf] %v86_v3  ;;  %29 = vst [vmem:[#allocation0 + $0x18] sm:$0xf] %v87_v4  ;;  %v89_v6 = vld [vmem:[%s147_s0 + $0x4] sm:$0xf] }
   0x5   :  { %34 = vst [vmem:[#allocation0 + $0x10] sm:$0xf] %v88_v5  ;;  %v39_v7 = vld [vmem:[%s147_s0] sm:$0xf]  ;;  %38 = vst [vmem:[#allocation0 + $0x8] sm:$0xf] %v89_v6 }
   0x6   :  { %40 = vst [vmem:[#allocation0] sm:$0xf] %v39_v7  ;;  %s93_s0 = smov 48   ;;  %vm75_vm4 = vcmask 261248  }
   0xb   :  { %v50_v8 = vld [vmem:[#allocation0 + $0x3] ss:$8 sm:$0xf0]   ;;  %v60_v9 = vld [vmem:[#allocation0 + $0x2] ss:$8 sm:$0xf0]  }
   0xc   :  { %v70_v14 = vld [vmem:[#allocation0 + $0x1] ss:$8 sm:$0xf0]   ;;  %v42_v17 = vld [vmem:[#allocation0] ss:$8 sm:$0xf0]  }
   0xd   :  { %v48_v10 = vld [vmem:[#allocation0 + $0x3] ss:$8 sm:$0xf]   ;;  %v58_v11 = vld [vmem:[#allocation0 + $0x2] ss:$8 sm:$0xf]  }
   0xe   :  { %v52_v12 = vsel %vm43_vm0, %v50_v8, %v48_v10  ;;  %v68_v13 = vld [vmem:[#allocation0 + $0x1] ss:$8 sm:$0xf]   ;;  %v41_v16 = vld [vmem:[#allocation0] ss:$8 sm:$0xf]   ;;  %v62_v18 = vsel %vm43_vm0, %v60_v9, %v58_v11 }
   0xf   :  { %53 = vrot.lane.b32.xlu0 %v52_v12, %s93_s0  ;;  %v72_v15 = vsel %vm43_vm0, %v70_v14, %v68_v13  ;;  %v44_v19 = vsel %vm43_vm0, %v42_v17, %v41_v16 }
  0x10   :  { %73 = vrot.lane.b32.xlu1 %v72_v15, %s94_s22  ;;  %46 = vst.msk [vmem:[%s148_s1] sm:$0xff] %vm45_vm1, %v44_v19  }
  0x13   :  { %63 = vrot.lane.b32.xlu0 %v62_v18, %s95_s25 }
  0x81   :  { %v54_v20 = vpop.permute.xlu0 %53  }
  0x82   :  { %56 = vst.msk [vmem:[%s148_s1] sm:$0xff] %vm55_vm2, %v54_v20   ;;  %v74_v21 = vpop.permute.xlu1 %73  }
  0x85   :  { %v64_v22 = vpop.permute.xlu0 %63  }
  0x86   :  { %66 = vst.msk [vmem:[%s148_s1] sm:$0xff] %vm65_vm3, %v64_v22  }
  0x87   :  { %76 = vst.msk [vmem:[%s148_s1] sm:$0xff] %vm75_vm4, %v74_v21  }

// kernel: forward.5
= control target key start
LH: loop header
LB: loop body
LE: loop exit
PB: predicated region body
PF: predicated region fallthrough
CT: control target
= control target key end

     0   :  { %s412_s12 = smov 0   ;;  %s462_s0 = inlined_call_operand.vmem [shape: bf16[2,8,64], index: 0, kind: input, shape index: {}]   ;;  %s463_s1 = inlined_call_operand.vmem [shape: f32[1,64], index: 1, kind: input, shape index: {}]   ;;  %s464_s2 = inlined_call_operand.vmem [shape: bf16[64,256], index: 2, kind: input, shape index: {}]   ;;  %s465_s3 = inlined_call_operand.vmem [shape: f32[2,8,256], index: 3, kind: output, shape index: {}]  }
   0x1 LB: > { %s339_s13 = sadd.s32 4294967295, %s389_s12   ;;  %p343_p0 = scmp.ge.s32.totalorder %s389_s12, 1  ;;  %s389_s12 = sphi %s412_s12, %s13_s12  }
   0x2   : > { %p136_p1 = scmp.lt.s32.totalorder %s389_s12, 3 }
   0x4   : > { %p137_p2 = pnand %p343_p0, %p136_p1 }
   0x5   : > { %p159_p3 = scmp.lt.s32.totalorder (!%p137_p2), %s339_s13, 1 }
   0x6   : > { %140 = sbr.rel (%p137_p2) target bundleno = 381 (0x17d), region = 32 }
   0xb   : > { %s467_s13 = smov (!%p159_p3, %s339_s13), 1  ;;  %vm172_vm0 = vcmask 523264   ;;  %v369_v4 = vld [vmem:[%s464_s2 + $0x34] ss:$8 sps:$4 sm:$0xff]   ;;  %v371_v5 = vld [vmem:[%s464_s2 + $0x30] ss:$8 sps:$4 sm:$0xff]  }
   0xc   : > { %s344_s14 = sshll.u32 %s467_s13, 2  ;;  %v372_v6 = vld [vmem:[%s464_s2 + $0x24] ss:$8 sps:$4 sm:$0xff]   ;;  %249 = vmatprep.subr.bf16.mxu0 %v369_v4  ;;  %v374_v7 = vld [vmem:[%s464_s2 + $0x20] ss:$8 sps:$4 sm:$0xff]   ;;  %v391_v8 = vmov 0  }
   0xd   : > { %s162_s17 = scalar_lea.vmem %s462_s0, %s344_s14  ;;  %250 = vmatpush1.bf16.msra.mxu0 %v371_v5  ;;  %273 = vmatprep.mubr.bf16.mxu0 %v391_v8  ;;  %v375_v9 = vld [vmem:[%s464_s2 + $0x14] ss:$8 sps:$4 sm:$0xff]   ;;  %v377_v10 = vld [vmem:[%s464_s2 + $0x10] ss:$8 sps:$4 sm:$0xff]   ;;  %v378_v11 = vld [vmem:[%s464_s2 + $0x4] ss:$8 sps:$4 sm:$0xff]  }
   0xe   : > { %v169_v0 = vld [vmem:[%s162_s17] sm:$0xf]  ;;  %251 = vmatprep.subr.bf16.mxu0 %v372_v6  ;;  %s359_s9 = sshll.u32 %s467_s13, 4 }
   0xf   : > { %v170_v1 = vunpack.c.l.bf16 %v169_v0  ;;  %v380_v12 = vld [vmem:[%s464_s2] ss:$8 sps:$4 sm:$0xff]   ;;  %s167_s14 = scalar_lea.vmem %s465_s3, %s359_s9 }
  0x10   : > { %v347_v17 = vld [vmem:[%s463_s1] ss:$0 sm:$0xff] }
  0x11   : > { %v171_v2 = vmul.f32 %v170_v1, %v170_v1  ;;  %252 = vmatpush1.bf16.msra.mxu0 %v374_v7 }
  0x12   : > { %253 = vmatprep.subr.bf16.mxu0 %v375_v9 }
  0x13   : > { %v173_v3 = vsel %vm172_vm0, %v171_v2, 0.0 }
  0x14   : > { %174 = vadd.xlane.f32.xlu0 %v173_v3 }
  0x15   : > { %254 = vmatpush1.bf16.msra.mxu0 %v377_v10 }
  0x16   : > { %255 = vmatprep.subr.bf16.mxu0 %v378_v11 }
  0x19   : > { %256 = vmatpush1.bf16.msra.mxu0 %v380_v12 }
  0x9d   : > { %v175_v13 = vpop.xlane.xlu0 %174 }
  0x9e   : > { %v177_v14 = vmul.f32 0.015625, %v175_v13 }
  0xa0   : > { %v178_v15 = vadd.f32 1e-06, %v177_v14 }
  0xa2   : > { %381 = vrsqrt.f32 %v178_v15 }
  0xaf   : > { %v382_v16 = vpop.eup %381 }
  0xb0   : > { %v180_v18 = vmul.f32 %v382_v16, %v170_v1 }
  0xb2   : > { %v188_v19 = vmul.f32 %v347_v17, %v180_v18 }
  0xb4   : > { %v189_v20 = vpack.c.bf16 %v188_v19, %v188_v19 }
  0xb6   : > { %356 = vmatmul.mubr.msk.bf16.vlgmr.msra.gmra.mxu0 %vm172_vm0, %v189_v20 }
 0x176   : > { %v275_v21 = vpop.f32.mrf.mxu0 }
 0x177   : > { %282 = vst [vmem:[%s167_s14] sm:$0xff] %v275_v21 }
 0x178   : > { %v277_v22 = vpop.f32.mrf.mxu0 }
 0x179   : > { %283 = vst [vmem:[%s167_s14 + $0x8] sm:$0xff] %v277_v22 }
 0x17a   : > { %v279_v23 = vpop.f32.mrf.mxu0 }
 0x17c   : > { %v280_v24 = vpop.f32.mrf.mxu0 }
 0x17d PF: > { %s13_s12 = sadd.s32 1, %s389_s12  }
 0x17e   : > { %p10_p4 = scmp.ge.s32.totalorder %s13_s12, 4  }
 0x180   :  { %12 = sbr.rel (!%p10_p4) target bundleno = 1 (0x1), region = 62 }

// kernel: forward.3
= control target key start
LH: loop header
LB: loop body
LE: loop exit
PB: predicated region body
PF: predicated region fallthrough
CT: control target
= control target key end

     0   :  { %s3246_s0 = inlined_call_operand.vmem [shape: bf16[2,8,64], index: 0, kind: input, shape index: {}]   ;;  %s3247_s1 = inlined_call_operand.vmem [shape: f32[2,1,8], index: 1, kind: input, shape index: {}]   ;;  %s3248_s2 = inlined_call_operand.vmem [shape: f32[8,64], index: 2, kind: input, shape index: {}]   ;;  %s3249_s3 = inlined_call_operand.vmem [shape: f32[8,64], index: 3, kind: input, shape index: {}]   ;;  %s3250_s4 = inlined_call_operand.vmem [shape: bf16[64,64], index: 4, kind: input, shape index: {}]   ;;  %s3251_s5 = inlined_call_operand.vmem [shape: bf16[32,32], index: 5, kind: input, shape index: {}]   ;;  %s3252_s6 = inlined_call_operand.vmem [shape: f32[1,64], index: 6, kind: input, shape index: {}]   ;;  %s3253_s7 = inlined_call_operand.vmem [shape: bf16[64,128], index: 7, kind: input, shape index: {}]   ;;  %s3254_s8 = inlined_call_operand.vmem [shape: bf16[64,24], index: 8, kind: input, shape index: {}]   ;;  %s3255_s9 = inlined_call_operand.vmem [shape: bf16[24,128], index: 9, kind: input, shape index: {}]   ;;  %s3256_s10 = inlined_call_operand.vmem [shape: f32[1,128], index: 10, kind: input, shape index: {}]   ;;  %s3257_s11 = inlined_call_operand.vmem [shape: bf16[64,64], index: 11, kind: input, shape index: {}]   ;;  %s3258_s12 = inlined_call_operand.vmem [shape: bf16[64,8], index: 12, kind: input, shape index: {}]   ;;  %s3259_s13 = inlined_call_operand.vmem [shape: bf16[8,64], index: 13, kind: input, shape index: {}]   ;;  %s3260_s14 = inlined_call_operand.vmem [shape: f32[1,64], index: 14, kind: input, shape index: {}]   ;;  %s3261_s15 = inlined_call_operand.vmem [shape: bf16[64,256], index: 15, kind: input, shape index: {}]   ;;  %s3262_s16 = inlined_call_operand.vmem [shape: bf16[64,16], index: 16, kind: input, shape index: {}]   ;;  %s3263_s17 = inlined_call_operand.vmem [shape: bf16[16,256], index: 17, kind: input, shape index: {}]   ;;  %s3264_s18 = inlined_call_operand.vmem [shape: bf16[128,64], index: 18, kind: input, shape index: {}]   ;;  %s3265_s19 = inlined_call_operand.vmem [shape: bf16[128,8], index: 19, kind: input, shape index: {}]   ;;  %s3266_s20 = inlined_call_operand.vmem [shape: bf16[8,64], index: 20, kind: input, shape index: {}]   ;;  %s3267_s21 = inlined_call_operand.vmem [shape: bf16[2,8,64], index: 21, kind: output, shape index: {}]  }
   0x1   :  { %3270 = sst [smem:[#allocation2_spill]] %s3246_s0 }
   0x2   :  { %3271 = sst [smem:[#allocation3_spill]] %s3247_s1 }
   0x3   :  { %3272 = sst [smem:[#allocation4_spill]] %s3248_s2  ;;  %s2868_s2 = smov 0  }
   0x4   :  { %3273 = sst [smem:[#allocation5_spill]] %s3249_s3 }
   0x5   :  { %3274 = sst [smem:[#allocation6_spill]] %s3250_s4 }
   0x6   :  { %3275 = sst [smem:[#allocation7_spill]] %s3251_s5 }
   0x7 LB: > { %s2288_s25 = sadd.s32 4294967295, %s2745_s2   ;;  %p2292_p0 = scmp.ge.s32.totalorder %s2745_s2, 1  ;;  %s2745_s2 = sphi %s2868_s2, %s31_s2  }
   0x8   : > { %p594_p1 = scmp.lt.s32.totalorder %s2745_s2, 3 }
   0xa   : > { %p595_p2 = pnand %p2292_p0, %p594_p1 }
   0xb   : > { %p655_p3 = scmp.lt.s32.totalorder (!%p595_p2), %s2288_s25, 1  ;;  %s3276_s28 = sld [smem:[#allocation2_spill]] (!%p595_p2) }
   0xc   : > { %598 = sbr.rel (%p595_p2) target bundleno = 3430 (0xd66), region = 104  ;;  %s3277_s22 = sld [smem:[#allocation4_spill]] (!%p595_p2) }
   0xd   : > { %s2749_s23 = smov (!%p595_p2), 64   ;;  %s3279_s30 = sld [smem:[#allocation7_spill]] (!%p595_p2) }
   0xe   : > { %s2750_s0 = smov (!%p595_p2), 112   ;;  %s2751_s4 = smov (!%p595_p2), 48  }
   0xf   : > { %s2752_s5 = smov (!%p595_p2), 96   ;;  %s2753_s1 = smov (!%p595_p2), 80  }
  0x10   : > { %s3281_s27 = sld [smem:[#allocation3_spill]] (!%p595_p2) }
  0x11   : > { %vm671_vm0 = vcmask 523264   ;;  %s3283_s25 = smov (!%p655_p3, %s2288_s25), 1  ;;  %v2656_v4 = vld [vmem:[%s3254_s8 + $0x18] sm:$0xff]   ;;  %v2747_v5 = vmov 0.0   ;;  %v2657_v6 = vld [vmem:[%s3254_s8 + $0x10] sm:$0xff]   ;;  %vm2748_vm1 = vmmov 0  }
  0x12   : > { %s2293_s26 = sshll.u32 %s3283_s25, 2  ;;  %2449 = vmatprep.subr.bf16.mxu1 %v2747_v5  ;;  %2457 = vmatprep.mubr.msk.bf16.mxu1 %vm2748_vm1, %v2747_v5  ;;  %v2658_v7 = vld [vmem:[%s3254_s8 + $0x8] sm:$0xff]   ;;  %v2659_v8 = vld [vmem:[%s3254_s8] sm:$0xff]   ;;  %vm788_vm2 = vcmask 1043456   ;;  %vm784_vm3 = vcmask 195584   ;;  %v2662_v22 = vld [vmem:[%s3253_s7 + $0x18] sm:$0xff]  }
  0x13   : > { %s658_s29 = scalar_lea.vmem %s3276_s28, %s2293_s26  ;;  %2450 = vmatpush3.bf16.msra.mxu1 %v2656_v4  ;;  %2481 = vmatprep.subr.bf16.mxu0 %v2747_v5  ;;  %v2295_v13 = vld [vmem:[%s3252_s6] ss:$0 sm:$0xff]  ;;  %v2660_v15 = vld [vmem:[%s3255_s9 + $0x8] ss:$0 sps:$4 sm:$0xff]   ;;  %v2663_v26 = vld [vmem:[%s3253_s7 + $0x10] sm:$0xff]   ;;  %vm1009_vm4 = vcmask 261120   ;;  %s665_s24 = scalar_lea.vmem %s3267_s21, %s2293_s26 }
  0x14   : > { %v667_v0 = vld [vmem:[%s658_s29] sm:$0xf]  ;;  %2451 = vmatprep.subr.bf16.mxu1 %v2747_v5  ;;  %2489 = vmatprep.mubr.msk.bf16.mxu0 %vm2748_vm1, %v2747_v5  ;;  %v790_v18 = vsel %vm788_vm2, %v2660_v15, 0  ;;  %v2664_v28 = vld [vmem:[%s3253_s7 + $0x8] sm:$0xff]   ;;  %s3280_s29 = sld [smem:[#allocation5_spill]]  ;;  %vm1079_vm5 = vcmask 130048  }
  0x15   : > { %v2884_v1 = vunpack.c.l.bf16 %v667_v0  ;;  %v2661_v19 = vld [vmem:[%s3255_s9] sm:$0xff]   ;;  %v2670_v34 = vld [vmem:[%s3279_s30 + $0x8] sm:$0xff]   ;;  %vm1128_vm10 = vcmask 64512   ;;  %s2756_s28 = smov 32   ;;  %vm1520_vm11 = vcmask 392192   ;;  %vm2224_vm12 = vcmask 519168  }
  0x16   : > { %v2930_v20 = vld [vmem:[%s3277_s22] sm:$0xff]  ;;  %s3278_s22 = sld [smem:[#allocation6_spill]]  ;;  %s661_s3 = scalar_lea.vmem %s3281_s27, %s3283_s25 }
  0x17   : > { %v670_v2 = vmul.f32 %v2884_v1, %v2884_v1  ;;  %2452 = vmatpush3.bf16.msra.mxu1 %v2657_v6  ;;  %986 = vrot.lane.b32.xlu1 %v2930_v20, %s2749_s23  ;;  %v2665_v29 = vld [vmem:[%s3253_s7] sm:$0xff]  }
  0x18   : > { %2453 = vmatprep.subr.bf16.mxu1 %v2747_v5  ;;  %v2671_v35 = vld [vmem:[%s3279_s30] sm:$0xff]  }
  0x19   : > { %v672_v3 = vsel %vm671_vm0, %v670_v2, 0.0  ;;  %v2309_v41 = vld [vmem:[%s3256_s10] ss:$0 sm:$0xff] }
  0x1a   : > { %673 = vadd.xlane.f32.xlu0 %v672_v3  ;;  %v905_v49 = vld [vmem:[%s3280_s29] sm:$0xff]  ;;  %s2757_s29 = smov 16  }
  0x1b   : > { %2454 = vmatpush3.bf16.msra.mxu1 %v2658_v7 }
  0x1c   : > { %2455 = vmatprep.subr.bf16.mxu1 %v2747_v5  ;;  %v2666_v30 = vld [vmem:[%s3278_s22 + $0x18] sm:$0xff]   ;;  %v2667_v31 = vld [vmem:[%s3278_s22 + $0x10] sm:$0xff]   ;;  %v2668_v32 = vld [vmem:[%s3278_s22 + $0x8] sm:$0xff]  }
  0x1d   : > { %2482 = vmatpush3.bf16.msra.mxu0 %v2666_v30  ;;  %v2669_v33 = vld [vmem:[%s3278_s22] sm:$0xff]  }
  0x1e   : > { %2483 = vmatprep.subr.bf16.mxu0 %v2747_v5 }
  0x1f   : > { %2456 = vmatpush3.bf16.msra.mxu1 %v2659_v8 }
  0x20   : > { %2461 = vmatprep.subr.bf16.mxu1 %v2747_v5 }
  0x21   : > { %2484 = vmatpush3.bf16.msra.mxu0 %v2667_v31 }
  0x22   : > { %2485 = vmatprep.subr.bf16.mxu0 %v2747_v5 }
  0x25   : > { %2486 = vmatpush3.bf16.msra.mxu0 %v2668_v32 }
  0x26   : > { %2487 = vmatprep.subr.bf16.mxu0 %v2747_v5 }
  0x29   : > { %2488 = vmatpush3.bf16.msra.mxu0 %v2669_v33 }
  0x2a   : > { %2501 = vmatprep.subr.bf16.mxu0 %v2747_v5 }
  0x89   : > { %v987_v62 = vpop.permute.xlu1 %986 }
  0xa3   : > { %v674_v9 = vpop.xlane.xlu0 %673 }
  0xa4   : > { %v676_v10 = vmul.f32 0.015625, %v674_v9 }
  0xa6   : > { %v677_v11 = vadd.f32 1e-06, %v676_v10 }
  0xa8   : > { %2715 = vrsqrt.f32 %v677_v11 }
  0xb5   : > { %v2716_v12 = vpop.eup %2715 }
  0xb6   : > { %v679_v14 = vmul.f32 %v2716_v12, %v2884_v1 }
  0xb8   : > { %v686_v16 = vmul.f32 %v2295_v13, %v679_v14  ;;  %v1060_v13 = vlaneseq  ;;  %v1059_v14 = vld [vmem:[%s661_s3] sm:$0x1] }
  0xb9   : > { %vm1065_vm6 = vcmp.gt.f32.partialorder %v1059_v14, 0.0 }
  0xba   : > { %v687_v17 = vpack.c.bf16 %v686_v16, %v686_v16  ;;  %v1061_v15 = vshrl.u32 %v1060_v13, 7 }
  0xbc   : > { %2458 = vmatmul.mubr.msk.bf16.vlgmr.msra.gmra.mxu1 %vm671_vm0, %v687_v17  ;;  %v1069_v16 = vsub.s32 0, %v1061_v15 }
  0xbd   : > { %2462 = vmatpush3.bf16.msra.mxu1 %v790_v18  ;;  %2465 = vmatprep.mubr.msk.bf16.mxu1 %vm2748_vm1, %v2747_v5 }
  0xbe   : > { %2463 = vmatprep.subr.bf16.mxu1 %v2747_v5 }
  0xc1   : > { %2464 = vmatpush3.bf16.msra.mxu1 %v2661_v19  ;;  %v1063_v19 = vand.u32 127, %v1060_v13 }
  0xc2   : > { %2469 = vmatprep.subr.bf16.mxu1 %v2747_v5 }
  0xc3   : > { %vm1064_vm7 = vcmp.le.s32.totalorder %v1063_v19, %v1061_v15 }
 0x17c   : > { %v765_v21 = vpop.f32.mrf.mxu1 }
 0x17d   : > { %v771_v23 = vpack.c.bf16 %v765_v21, %v765_v21 }
 0x17e   : > { %v2459_v24 = vpop.f32.mrf.mxu1 }
 0x17f   : > { %2466 = vmatmul.mubr.msk.bf16.vlgmr.msra.gmra.mxu1 %vm784_vm3, %v771_v23 }
 0x180   : > { %2470 = vmatpush3.bf16.msra.mxu1 %v2662_v22  ;;  %v768_v25 = vpop.f32.mrf.mxu1  ;;  %2477 = vmatprep.mubr.msk.bf16.mxu1 %vm2748_vm1, %v2747_v5  ;;  %v2755_v22 = vmov -1e+09  }
 0x181   : > { %2471 = vmatprep.subr.bf16.mxu1 %v2747_v5 }
 0x182   : > { %v2460_v27 = vpop.f32.mrf.mxu1 }
 0x184   : > { %2472 = vmatpush3.bf16.msra.mxu1 %v2663_v26 }
 0x185   : > { %2473 = vmatprep.subr.bf16.mxu1 %v2747_v5 }
 0x188   : > { %2474 = vmatpush3.bf16.msra.mxu1 %v2664_v28 }
 0x189   : > { %2475 = vmatprep.subr.bf16.mxu1 %v2747_v5 }
 0x18c   : > { %2476 = vmatpush3.bf16.msra.mxu1 %v2665_v29 }
 0x18d   : > { %2493 = vmatprep.subr.bf16.mxu1 %v2747_v5 }
 0x18f   : > { %2478 = vmatmul.mubr.msk.bf16.vlgmr.msra.gmra.mxu1 %vm671_vm0, %v687_v17  ;;  %v2754_v17 = vmov 0  }
 0x190   : > { %2497 = vmatprep.mubr.msk.bf16.mxu1 %vm2748_vm1, %v2747_v5  ;;  %2494 = vmatpush3.bf16.msra.mxu1 %v2670_v34  ;;  %v1066_v18 = vsel %vm1065_vm6, 1, %v2754_v17 }
 0x191   : > { %2495 = vmatprep.subr.bf16.mxu1 %v2747_v5 }
 0x194   : > { %2496 = vmatpush3.bf16.msra.mxu1 %v2671_v35 }
 0x195   : > { %2507 = vmatprep.subr.bf16.mxu1 %v2747_v5 }
 0x23f   : > { %v826_v36 = vpop.f32.mrf.mxu1 }
 0x241   : > { %v2467_v37 = vpop.f32.mrf.mxu1 }
 0x243   : > { %v829_v38 = vpop.f32.mrf.mxu1 }
 0x245   : > { %v2468_v39 = vpop.f32.mrf.mxu1 }
 0x24f   : > { %v890_v40 = vpop.f32.mrf.mxu1 }
 0x250   : > { %v891_v42 = vadd.f32 %v890_v40, %v826_v36 }
 0x251   : > { %v2479_v43 = vpop.f32.mrf.mxu1 }
 0x252   : > { %v903_v44 = vadd.f32 %v2309_v41, %v891_v42 }
 0x253   : > { %v893_v45 = vpop.f32.mrf.mxu1 }
 0x254   : > { %v2982_v46 = vpack.c.bf16 %v903_v44, %v903_v44  ;;  %v906_v51 = vmul.f32 %v2930_v20, %v903_v44  ;;  %v989_v63 = vmul.f32 %v987_v62, %v903_v44  ;;  %v1070_v20 = vrot.slane %v1066_v18, %v1069_v16 }
 0x255   : > { %v2480_v47 = vpop.f32.mrf.mxu1 }
 0x256   : > { %995 = vrot.lane.b32.xlu0 %v2982_v46, %s2749_s23  ;;  %2490 = vmatmul.mubr.msk.bf16.vlgmr.msra.gmra.mxu0 %vm671_vm0, %v2982_v46  ;;  %vm1071_vm8 = vcmp.eq.s32.totalorder %v1070_v20, 1 }
 0x257   : > { %2503 = vmatprep.mubr.msk.bf16.mxu0 %vm2748_vm1, %v2747_v5  ;;  %vm1072_vm9 = vmand %vm1064_vm7, %vm1071_vm8 }
 0x258   : > { %v1073_v23 = vsel %vm1072_vm9, 0.0, %v2755_v22 }
 0x2c8   : > { %v996_v48 = vpop.permute.xlu0 %995 }
 0x2c9   : > { %2498 = vmatmul.mubr.msk.bf16.vlgmr.msra.gmra.mxu1 %vm1009_vm4, %v996_v48 }
 0x2ca   : > { %2509 = vmatprep.mubr.msk.bf16.mxu1 %vm2748_vm1, %v2747_v5 }
 0x316   : > { %v977_v50 = vpop.f32.mrf.mxu0 }
 0x317   : > { %v983_v52 = vmul.f32 %v977_v50, %v905_v49 }
 0x318   : > { %v2491_v53 = vpop.f32.mrf.mxu0 }
 0x319   : > { %v984_v54 = vadd.f32 %v983_v52, %v906_v51 }
 0x31a   : > { %v980_v55 = vpop.f32.mrf.mxu0 }
 0x31b   : > { %v1074_v4 = vpack.c.bf16 %v984_v54, %v984_v54 }
 0x31c   : > { %v2492_v56 = vpop.f32.mrf.mxu0 }
 0x389   : > { %v1047_v57 = vpop.f32.mrf.mxu1 }
 0x38a   : > { %v1053_v58 = vmul.f32 %v1047_v57, %v905_v49 }
 0x38b   : > { %v2499_v59 = vpop.f32.mrf.mxu1 }
 0x38c   : > { %1055 = vrot.lane.b32.xlu1 %v1053_v58, %s2749_s23 }
 0x38d   : > { %v1050_v60 = vpop.f32.mrf.mxu1 }
 0x38f   : > { %v2500_v61 = vpop.f32.mrf.mxu1 }
 0x3fe   : > { %v1056_v0 = vpop.permute.xlu1 %1055 }
 0x3ff   : > { %v1058_v2 = vadd.f32 %v1056_v0, %v989_v63 }
 0x401   : > { %v1075_v3 = vpack.c.bf16 %v1058_v2, %v1058_v2 }
 0x403   : > { %1077 = vrot.lane.b32.xlu1 %v1075_v3, %s2749_s23 }
 0x407   : > { %1190 = vrot.lane.b32.xlu1 %v1074_v4, %s2750_s0 }
 0x40b   : > { %1294 = vrot.lane.b32.xlu1 %v1075_v3, %s2751_s4 }
 0x40f   : > { %1292 = vrot.lane.b32.xlu1 %v1074_v4, %s2752_s5 }
 0x413   : > { %1404 = vrot.lane.b32.xlu1 %v1074_v4, %s2753_s1 }
 0x475   : > { %v1078_v6 = vpop.permute.xlu1 %1077 }
 0x476   : > { %v1084_v7 = vsel %vm1079_vm5, %v1078_v6, 0 }
 0x477   : > { %2502 = vmatpush3.bf16.xpose.msra.mxu0 %v1084_v7 }
 0x478   : > { %2513 = vmatprep.subr.bf16.mxu0 %v2747_v5 }
 0x479   : > { %v1191_v8 = vpop.permute.xlu1 %1190 }
 0x47d   : > { %v1295_v9 = vpop.permute.xlu1 %1294 }
 0x47e   : > { %2504 = vmatmul.mubr.msk.bf16.vlgmr.msra.gmra.mxu0 %vm1079_vm5, %v1074_v4  ;;  %v1300_v10 = vsel %vm1079_vm5, %v1295_v9, 0 }
 0x47f   : > { %2514 = vmatpush3.bf16.xpose.msra.mxu0 %v1084_v7  ;;  %2515 = vmatprep.mubr.msk.bf16.mxu0 %vm2748_vm1, %v2747_v5 }
 0x480   : > { %2525 = vmatprep.subr.bf16.mxu0 %v2747_v5 }
 0x481   : > { %v1293_v11 = vpop.permute.xlu1 %1292 }
 0x485   : > { %v1405_v12 = vpop.permute.xlu1 %1404 }
 0x486   : > { %2516 = vmatmul.mubr.msk.bf16.vlgmr.msra.gmra.mxu0 %vm1079_vm5, %v1191_v8 }
 0x487   : > { %2526 = vmatpush3.bf16.xpose.msra.mxu0 %v1300_v10  ;;  %2527 = vmatprep.mubr.msk.bf16.mxu0 %vm2748_vm1, %v2747_v5 }
 0x488   : > { %2537 = vmatprep.subr.bf16.mxu0 %v2747_v5 }
 0x48e   : > { %2528 = vmatmul.mubr.msk.bf16.vlgmr.msra.gmra.mxu0 %vm1079_vm5, %v1293_v11 }
 0x48f   : > { %2538 = vmatpush3.bf16.xpose.msra.mxu0 %v1300_v10  ;;  %2539 = vmatprep.mubr.msk.bf16.mxu0 %vm2748_vm1, %v2747_v5 }
 0x490   : > { %2549 = vmatprep.subr.bf16.mxu0 %v2747_v5 }
 0x496   : > { %2540 = vmatmul.mubr.msk.bf16.vlgmr.msra.gmra.mxu0 %vm1079_vm5, %v1405_v12 }
 0x497   : > { %2557 = vmatprep.mubr.msk.bf16.mxu0 %vm2748_vm1, %v2747_v5 }
 0x53e   : > { %v1120_v21 = vpop.f32.mrf.mxu0 }
 0x53f   : > { %v1126_v24 = vmul.f32 0.25, %v1120_v21 }
 0x540   : > { %v2505_v25 = vpop.f32.mrf.mxu0 }
 0x541   : > { %v1127_v26 = vadd.f32 %v1126_v24, %v1073_v23 }
 0x542   : > { %v1123_v27 = vpop.f32.mrf.mxu0 }
 0x543   : > { %v1129_v28 = vsel %vm1128_vm10, %v1127_v26, -inf }
 0x544   : > { %1130 = vmax.xlane.f32.xlu0 %v1129_v28  ;;  %v2506_v29 = vpop.f32.mrf.mxu0 }
 0x546   : > { %v1229_v30 = vpop.f32.mrf.mxu0 }
 0x547   : > { %v1235_v31 = vmul.f32 0.25, %v1229_v30  ;;  %v2672_v30 = vld [vmem:[%s3258_s12 + $0x18] sm:$0xff]  }
 0x548   : > { %v2517_v32 = vpop.f32.mrf.mxu0  ;;  %2550 = vmatpush3.bf16.msra.mxu0 %v2672_v30 }
 0x549   : > { %v1236_v33 = vadd.f32 %v1235_v31, %v1073_v23  ;;  %2551 = vmatprep.subr.bf16.mxu0 %v2747_v5 }
 0x54a   : > { %v1232_v34 = vpop.f32.mrf.mxu0 }
 0x54b   : > { %v1237_v35 = vsel %vm1128_vm10, %v1236_v33, -inf }
 0x54c   : > { %1238 = vmax.xlane.f32.xlu1 %v1237_v35  ;;  %v2518_v36 = vpop.f32.mrf.mxu0  ;;  %v2674_v35 = vld [vmem:[%s3258_s12 + $0x8] sm:$0xff]  }
 0x54e   : > { %v1336_v37 = vpop.f32.mrf.mxu0 }
 0x54f   : > { %v1342_v38 = vmul.f32 0.25, %v1336_v37 }
 0x550   : > { %v2529_v39 = vpop.f32.mrf.mxu0 }
 0x551   : > { %v1343_v40 = vadd.f32 %v1342_v38, %v1073_v23  ;;  %v2675_v39 = vld [vmem:[%s3258_s12] sm:$0xff]  }
 0x552   : > { %v1339_v41 = vpop.f32.mrf.mxu0 }
 0x553   : > { %v1344_v42 = vsel %vm1128_vm10, %v1343_v40, -inf }
 0x554   : > { %1345 = vmax.xlane.f32.xlu0 %v1344_v42  ;;  %v2530_v43 = vpop.f32.mrf.mxu0  ;;  %v1607_v42 = vld [vmem:[%s3259_s13] sm:$0xf] }
 0x556   : > { %v1443_v44 = vpop.f32.mrf.mxu0 }
 0x557   : > { %v1449_v45 = vmul.f32 0.25, %v1443_v44  ;;  %v1612_v44 = vsel %vm788_vm2, %v1607_v42, 0 }
 0x558   : > { %v2541_v47 = vpop.f32.mrf.mxu0 }
 0x559   : > { %v1450_v48 = vadd.f32 %v1449_v45, %v1073_v23 }
 0x55a   : > { %v1446_v49 = vpop.f32.mrf.mxu0 }
 0x55b   : > { %v1451_v50 = vsel %vm1128_vm10, %v1450_v48, -inf }
 0x55c   : > { %1452 = vmax.xlane.f32.xlu0 %v1451_v50  ;;  %v2542_v51 = vpop.f32.mrf.mxu0 }
 0x5cd   : > { %v1131_v52 = vpop.xlane.xlu0 %1130 }
 0x5ce   : > { %v1132_v53 = vsub.f32 %v1127_v26, %v1131_v52 }
 0x5d0   : > { %v1133_v54 = vmul.f32 1.442695, %v1132_v53 }
 0x5d2   : > { %2717 = vpow2.f32 %v1133_v54 }
 0x5d5   : > { %v1239_v55 = vpop.xlane.xlu1 %1238 }
 0x5d6   : > { %v1240_v56 = vsub.f32 %v1236_v33, %v1239_v55  ;;  %v2673_v33 = vld [vmem:[%s3258_s12 + $0x10] sm:$0xff]  }
 0x5d7   : > { %2552 = vmatpush3.bf16.msra.mxu0 %v2673_v33 }
 0x5d8   : > { %v1241_v57 = vmul.f32 1.442695, %v1240_v56  ;;  %2553 = vmatprep.subr.bf16.mxu0 %v2747_v5 }
 0x5da   : > { %2719 = vpow2.f32 %v1241_v57 }
 0x5db   : > { %2554 = vmatpush3.bf16.msra.mxu0 %v2674_v35  ;;  %v2687_v35 = vld [vmem:[%s3261_s15 + $0x20] ss:$8 sps:$4 sm:$0xff]  }
 0x5dc   : > { %2555 = vmatprep.subr.bf16.mxu0 %v2747_v5 }
 0x5dd   : > { %v1346_v58 = vpop.xlane.xlu0 %1345 }
 0x5de   : > { %v1347_v59 = vsub.f32 %v1343_v40, %v1346_v58 }
 0x5df   : > { %v2718_v60 = vpop.eup %2717  ;;  %2556 = vmatpush3.bf16.msra.mxu0 %v2675_v39 }
 0x5e0   : > { %v1348_v61 = vmul.f32 1.442695, %v1347_v59  ;;  %v1135_v62 = vsel %vm1128_vm10, %v2718_v60, 0.0  ;;  %2579 = vmatprep.subr.bf16.mxu0 %v2747_v5 }
 0x5e1   : > { %1136 = vadd.xlane.f32.xlu1 %v1135_v62 }
 0x5e2   : > { %2721 = vpow2.f32 %v1348_v61  ;;  %v2676_v61 = vld [vmem:[%s3257_s11 + $0x18] sm:$0xff]  }
 0x5e5   : > { %v1453_v63 = vpop.xlane.xlu0 %1452 }
 0x5e6   : > { %v1454_v0 = vsub.f32 %v1450_v48, %v1453_v63 }
 0x5e7   : > { %v2720_v2 = vpop.eup %2719 }
 0x5e8   : > { %v1455_v3 = vmul.f32 1.442695, %v1454_v0  ;;  %v1243_v4 = vsel %vm1128_vm10, %v2720_v2, 0.0 }
 0x5e9   : > { %1244 = vadd.xlane.f32.xlu0 %v1243_v4  ;;  %v2678_v4 = vld [vmem:[%s3257_s11 + $0x8] sm:$0xff]  }
 0x5ea   : > { %2723 = vpow2.f32 %v1455_v3 }
 0x5ef   : > { %v2722_v6 = vpop.eup %2721 }
 0x5f0   : > { %v1350_v7 = vsel %vm1128_vm10, %v2722_v6, 0.0 }
 0x5f1   : > { %1351 = vadd.xlane.f32.xlu1 %v1350_v7 }
 0x5f7   : > { %v2724_v8 = vpop.eup %2723 }
 0x5f8   : > { %v1457_v9 = vsel %vm1128_vm10, %v2724_v8, 0.0 }
 0x5f9   : > { %1458 = vadd.xlane.f32.xlu0 %v1457_v9 }
 0x602   : > { %1141 = vrot.lane.b32.xlu1 %v2982_v46, %s2756_s28 }
 0x60f   : > { %1356 = vrot.lane.b32.xlu0 %v2982_v46, %s2757_s29 }
 0x66a   : > { %v1137_v10 = vpop.xlane.xlu1 %1136 }
 0x66b   : > { %2725 = vrcp.f32 %v1137_v10 }
 0x672   : > { %v1245_v11 = vpop.xlane.xlu0 %1244 }
 0x673   : > { %2727 = vrcp.f32 %v1245_v11 }
 0x678   : > { %v2726_v12 = vpop.eup %2725 }
 0x679   : > { %v1139_v14 = vmul.f32 %v2726_v12, %v2718_v60 }
 0x67a   : > { %v1352_v13 = vpop.xlane.xlu1 %1351 }
 0x67b   : > { %2729 = vrcp.f32 %v1352_v13  ;;  %v1140_v18 = vpack.c.bf16 %v1139_v14, %v1139_v14 }
 0x67e   : > { %v1142_v15 = vpop.permute.xlu1 %1141 }
 0x67f   : > { %v1147_v16 = vsel %vm788_vm2, %v1142_v15, 0 }
 0x680   : > { %2508 = vmatpush3.bf16.msra.mxu1 %v1147_v16  ;;  %v2728_v19 = vpop.eup %2727 }
 0x681   : > { %2519 = vmatprep.subr.bf16.mxu1 %v2747_v5  ;;  %v1247_v46 = vmul.f32 %v2728_v19, %v2720_v2  ;;  %v2677_v2 = vld [vmem:[%s3257_s11 + $0x10] sm:$0xff]  }
 0x682   : > { %v1459_v20 = vpop.xlane.xlu0 %1458 }
 0x683   : > { %2510 = vmatmul.mubr.msk.bf16.vlgmr.msra.gmra.mxu1 %vm1128_vm10, %v1140_v18  ;;  %2731 = vrcp.f32 %v1459_v20  ;;  %v1248_v22 = vpack.c.bf16 %v1247_v46, %v1247_v46  ;;  %v2680_v20 = vld [vmem:[%s3262_s16 + $0x18] sm:$0xff]   ;;  %v2681_v46 = vld [vmem:[%s3262_s16 + $0x10] sm:$0xff]  }
 0x684   : > { %2520 = vmatpush3.bf16.msra.mxu1 %v1147_v16  ;;  %2521 = vmatprep.mubr.msk.bf16.mxu1 %vm2748_vm1, %v2747_v5 }
 0x685   : > { %2531 = vmatprep.subr.bf16.mxu1 %v2747_v5 }
 0x686   : > { %v1357_v21 = vpop.permute.xlu0 %1356 }
 0x687   : > { %v1362_v24 = vsel %vm788_vm2, %v1357_v21, 0  ;;  %v2683_v21 = vld [vmem:[%s3262_s16] sm:$0xff]  }
 0x688   : > { %v2730_v23 = vpop.eup %2729 }
 0x689   : > { %v1354_v25 = vmul.f32 %v2730_v23, %v2722_v6  ;;  %v2679_v6 = vld [vmem:[%s3257_s11] sm:$0xff]  }
 0x68a   : > { %v2696_v23 = vld [vmem:[%s3263_s17] ss:$8 sps:$4 sm:$0xff]  }
 0x68b   : > { %2522 = vmatmul.mubr.msk.bf16.vlgmr.msra.gmra.mxu1 %vm1128_vm10, %v1248_v22  ;;  %v1355_v26 = vpack.c.bf16 %v1354_v25, %v1354_v25  ;;  %v2686_v22 = vld [vmem:[%s3261_s15 + $0x34] ss:$8 sps:$4 sm:$0xff]  }
 0x68c   : > { %2532 = vmatpush3.bf16.msra.mxu1 %v1362_v24  ;;  %2533 = vmatprep.mubr.msk.bf16.mxu1 %vm2748_vm1, %v2747_v5 }
 0x68d   : > { %2543 = vmatprep.subr.bf16.mxu1 %v2747_v5 }
 0x690   : > { %v2732_v27 = vpop.eup %2731 }
 0x691   : > { %v1461_v28 = vmul.f32 %v2732_v27, %v2724_v8 }
 0x693   : > { %2534 = vmatmul.mubr.msk.bf16.vlgmr.msra.gmra.mxu1 %vm1128_vm10, %v1355_v26  ;;  %v1462_v29 = vpack.c.bf16 %v1461_v28, %v1461_v28 }
 0x694   : > { %2544 = vmatpush3.bf16.msra.mxu1 %v1362_v24  ;;  %2545 = vmatprep.mubr.msk.bf16.mxu1 %vm2748_vm1, %v2747_v5  ;;  %v2698_v24 = vld [vmem:[%s3263_s17 + $0x4] ss:$8 sps:$4 sm:$0xff]  }
 0x695   : > { %2561 = vmatprep.subr.bf16.mxu1 %v2747_v5 }
 0x69b   : > { %2546 = vmatmul.mubr.msk.bf16.vlgmr.msra.gmra.mxu1 %vm1128_vm10, %v1462_v29  ;;  %v2337_v29 = vld [vmem:[%s3260_s14] ss:$0 sm:$0xff] }
 0x69c   : > { %2563 = vmatprep.mubr.msk.bf16.mxu1 %vm2748_vm1, %v2747_v5  ;;  %2562 = vmatpush3.bf16.msra.mxu1 %v1612_v44 }
 0x69d   : > { %2567 = vmatprep.subr.bf16.mxu1 %v2747_v5 }
 0x743   : > { %v1183_v31 = vpop.f32.mrf.mxu1 }
 0x745   : > { %v2511_v32 = vpop.f32.mrf.mxu1 }
 0x746   : > { %v2684_v32 = vld [vmem:[%s3261_s15 + $0x30] ss:$8 sps:$4 sm:$0xff]  }
 0x747   : > { %v1186_v34 = vpop.f32.mrf.mxu1 }
 0x748   : > { %v2689_v34 = vld [vmem:[%s3261_s15 + $0x24] ss:$8 sps:$4 sm:$0xff]  }
 0x749   : > { %v2512_v36 = vpop.f32.mrf.mxu1 }
 0x74a   : > { %v2692_v36 = vld [vmem:[%s3261_s15 + $0x14] ss:$8 sps:$4 sm:$0xff]  }
 0x74b   : > { %v1286_v37 = vpop.f32.mrf.mxu1 }
 0x74c   : > { %1507 = vrot.lane.b32.xlu1 %v1286_v37, %s2757_s29  ;;  %v2690_v37 = vld [vmem:[%s3261_s15 + $0x10] ss:$8 sps:$4 sm:$0xff]  }
 0x74d   : > { %v2523_v38 = vpop.f32.mrf.mxu1 }
 0x74e   : > { %v2695_v38 = vld [vmem:[%s3261_s15 + $0x4] ss:$8 sps:$4 sm:$0xff]  }
 0x74f   : > { %v1289_v40 = vpop.f32.mrf.mxu1 }
 0x751   : > { %v2524_v41 = vpop.f32.mrf.mxu1 }
 0x753   : > { %v1398_v43 = vpop.f32.mrf.mxu1 }
 0x754   : > { %1511 = vrot.lane.b32.xlu1 %v1398_v43, %s2756_s28 }
 0x755   : > { %v2535_v45 = vpop.f32.mrf.mxu1 }
 0x757   : > { %v1401_v47 = vpop.f32.mrf.mxu1 }
 0x759   : > { %v2536_v48 = vpop.f32.mrf.mxu1 }
 0x75b   : > { %v1500_v49 = vpop.f32.mrf.mxu1 }
 0x75c   : > { %1515 = vrot.lane.b32.xlu0 %v1500_v49, %s2751_s4  ;;  %v2699_v49 = vld [vmem:[%s3265_s19 + $0x38] sm:$0xff]  }
 0x75d   : > { %v2547_v50 = vpop.f32.mrf.mxu1 }
 0x75e   : > { %v2700_v50 = vld [vmem:[%s3265_s19 + $0x30] sm:$0xff]  }
 0x75f   : > { %v1503_v51 = vpop.f32.mrf.mxu1 }
 0x760   : > { %v2701_v51 = vld [vmem:[%s3265_s19 + $0x28] sm:$0xff]  }
 0x761   : > { %v2548_v52 = vpop.f32.mrf.mxu1 }
 0x762   : > { %v2702_v52 = vld [vmem:[%s3265_s19 + $0x20] sm:$0xff]  }
 0x7be   : > { %v1508_v53 = vpop.permute.xlu1 %1507 }
 0x7bf   : > { %v1518_v55 = vsel %vm1079_vm5, %v1183_v31, %v1508_v53  ;;  %v2703_v53 = vld [vmem:[%s3265_s19 + $0x18] sm:$0xff]  }
 0x7c6   : > { %v1512_v54 = vpop.permute.xlu1 %1511 }
 0x7c7   : > { %v1519_v56 = vsel %vm1009_vm4, %v1518_v55, %v1512_v54  ;;  %v2704_v54 = vld [vmem:[%s3265_s19 + $0x10] sm:$0xff]   ;;  %v2705_v55 = vld [vmem:[%s3265_s19 + $0x8] sm:$0xff]  }
 0x7ce   : > { %v1516_v57 = vpop.permute.xlu0 %1515 }
 0x7cf   : > { %v1521_v58 = vsel %vm1520_vm11, %v1519_v56, %v1516_v57  ;;  %v2706_v56 = vld [vmem:[%s3265_s19] sm:$0xff]  }
 0x7d0   : > { %v1522_v59 = vpack.c.bf16 %v1521_v58, %v1521_v58  ;;  %v2087_v57 = vld [vmem:[%s3266_s20] sm:$0xf] }
 0x7d1   : > { %v2092_v58 = vsel %vm788_vm2, %v2087_v57, 0 }
 0x7d2   : > { %2558 = vmatmul.mubr.msk.bf16.vlgmr.msra.gmra.mxu0 %vm671_vm0, %v1522_v59 }
 0x7d3   : > { %2587 = vmatprep.mubr.msk.bf16.mxu0 %vm2748_vm1, %v2747_v5  ;;  %2580 = vmatpush3.bf16.msra.mxu0 %v2680_v20  ;;  %v2710_v20 = vld [vmem:[%s3264_s18 + $0x20] sm:$0xff]  }
 0x7d4   : > { %2581 = vmatprep.subr.bf16.mxu0 %v2747_v5 }
 0x7d7   : > { %2582 = vmatpush3.bf16.msra.mxu0 %v2681_v46  ;;  %v2711_v46 = vld [vmem:[%s3264_s18 + $0x18] sm:$0xff]  }
 0x7d8   : > { %2583 = vmatprep.subr.bf16.mxu0 %v2747_v5 }
 0x892   : > { %v1600_v60 = vpop.f32.mrf.mxu0 }
 0x893   : > { %v1606_v62 = vpack.c.bf16 %v1600_v60, %v1600_v60 }
 0x894   : > { %v2559_v63 = vpop.f32.mrf.mxu0 }
 0x895   : > { %2564 = vmatmul.mubr.msk.bf16.vlgmr.msra.gmra.mxu1 %vm1128_vm10, %v1606_v62 }
 0x896   : > { %2568 = vmatpush3.bf16.msra.mxu1 %v2676_v61  ;;  %v1603_v0 = vpop.f32.mrf.mxu0  ;;  %2575 = vmatprep.mubr.msk.bf16.mxu1 %vm2748_vm1, %v2747_v5 }
 0x897   : > { %2569 = vmatprep.subr.bf16.mxu1 %v2747_v5 }
 0x898   : > { %v2560_v3 = vpop.f32.mrf.mxu0 }
 0x89a   : > { %2570 = vmatpush3.bf16.msra.mxu1 %v2677_v2 }
 0x89b   : > { %2571 = vmatprep.subr.bf16.mxu1 %v2747_v5 }
 0x89e   : > { %2572 = vmatpush3.bf16.msra.mxu1 %v2678_v4 }
 0x89f   : > { %2573 = vmatprep.subr.bf16.mxu1 %v2747_v5 }
 0x8a2   : > { %2574 = vmatpush3.bf16.msra.mxu1 %v2679_v6 }
 0x8a3   : > { %1849 = vmatprep.subr.bf16.mxu1 %v2698_v24 }
 0x8a5   : > { %2576 = vmatmul.mubr.msk.bf16.vlgmr.msra.gmra.mxu1 %vm671_vm0, %v1522_v59 }
 0x8a6   : > { %1867 = vmatprep.mubr.bf16.mxu1 %v2754_v17  ;;  %1850 = vmatpush1.bf16.msra.mxu1 %v2696_v23 }
 0x8a7   : > { %2591 = vmatprep.subr.bf16.mxu1 %v2747_v5 }
 0x955   : > { %v1648_v7 = vpop.f32.mrf.mxu1 }
 0x957   : > { %v2565_v8 = vpop.f32.mrf.mxu1 }
 0x959   : > { %v1651_v9 = vpop.f32.mrf.mxu1 }
 0x95b   : > { %v2566_v10 = vpop.f32.mrf.mxu1 }
 0x965   : > { %v1712_v11 = vpop.f32.mrf.mxu1 }
 0x966   : > { %v1713_v12 = vadd.f32 %v1712_v11, %v1648_v7  ;;  %v2707_v11 = vld [vmem:[%s3264_s18 + $0x38] sm:$0xff]  }
 0x967   : > { %v2577_v13 = vpop.f32.mrf.mxu1 }
 0x968   : > { %v3103_v14 = vadd.f32 %v1713_v12, %v2884_v1  ;;  %v2682_v1 = vld [vmem:[%s3262_s16 + $0x8] sm:$0xff]  }
 0x969   : > { %v1715_v15 = vpop.f32.mrf.mxu1  ;;  %2584 = vmatpush3.bf16.msra.mxu0 %v2682_v1  ;;  %v2712_v1 = vld [vmem:[%s3264_s18 + $0x10] sm:$0xff]  }
 0x96a   : > { %v1720_v16 = vmul.f32 %v3103_v14, %v3103_v14  ;;  %2585 = vmatprep.subr.bf16.mxu0 %v2747_v5 }
 0x96b   : > { %v2578_v18 = vpop.f32.mrf.mxu1 }
 0x96c   : > { %v1721_v19 = vsel %vm671_vm0, %v1720_v16, 0.0  ;;  %v2708_v16 = vld [vmem:[%s3264_s18 + $0x30] sm:$0xff]  }
 0x96d   : > { %1722 = vadd.xlane.f32.xlu1 %v1721_v19  ;;  %2586 = vmatpush3.bf16.msra.mxu0 %v2683_v21  ;;  %v2709_v19 = vld [vmem:[%s3264_s18 + $0x28] sm:$0xff]  }
 0x96e   : > { %1924 = vmatprep.subr.bf16.mxu0 %v2686_v22  ;;  %v2713_v21 = vld [vmem:[%s3264_s18 + $0x8] sm:$0xff]   ;;  %v2714_v22 = vld [vmem:[%s3264_s18] sm:$0xff]  }
 0x9f6   : > { %v1723_v25 = vpop.xlane.xlu1 %1722 }
 0x9f7   : > { %v1724_v26 = vmul.f32 0.015625, %v1723_v25 }
 0x9f9   : > { %v1725_v27 = vadd.f32 1e-06, %v1724_v26 }
 0x9fb   : > { %2733 = vrsqrt.f32 %v1725_v27 }
 0xa08   : > { %v2734_v28 = vpop.eup %2733 }
 0xa09   : > { %v1727_v30 = vmul.f32 %v2734_v28, %v3103_v14 }
 0xa0b   : > { %v1734_v31 = vmul.f32 %v2337_v29, %v1727_v30 }
 0xa0d   : > { %v1735_v33 = vpack.c.bf16 %v1734_v31, %v1734_v31 }
 0xa0f   : > { %2588 = vmatmul.mubr.msk.bf16.vlgmr.msra.gmra.mxu0 %vm671_vm0, %v1735_v33 }
 0xa10   : > { %1925 = vmatpush1.bf16.msra.mxu0 %v2684_v32  ;;  %1948 = vmatprep.mubr.bf16.mxu0 %v2754_v17  ;;  %v2693_v17 = vld [vmem:[%s3261_s15] ss:$8 sps:$4 sm:$0xff]  }
 0xa11   : > { %1926 = vmatprep.subr.bf16.mxu0 %v2689_v34 }
 0xa14   : > { %1927 = vmatpush1.bf16.msra.mxu0 %v2687_v35 }
 0xa15   : > { %1928 = vmatprep.subr.bf16.mxu0 %v2692_v36 }
 0xa18   : > { %1929 = vmatpush1.bf16.msra.mxu0 %v2690_v37 }
 0xa19   : > { %1930 = vmatprep.subr.bf16.mxu0 %v2695_v38 }
 0xa1c   : > { %1931 = vmatpush1.bf16.msra.mxu0 %v2693_v17 }
 0xa1d   : > { %2611 = vmatprep.subr.bf16.mxu0 %v2747_v5 }
 0xa1f   : > { %2354 = vmatmul.mubr.msk.bf16.vlgmr.msra.gmra.mxu0 %vm671_vm0, %v1735_v33 }
 0xa20   : > { %2613 = vmatprep.mubr.msk.bf16.mxu0 %vm2748_vm1, %v2747_v5  ;;  %2612 = vmatpush3.bf16.msra.mxu0 %v2092_v58 }
 0xa21   : > { %2617 = vmatprep.subr.bf16.mxu0 %v2747_v5 }
 0xacf   : > { %v1813_v39 = vpop.f32.mrf.mxu0 }
 0xad0   : > { %v1819_v40 = vpack.c.bf16 %v1813_v39, %v1813_v39 }
 0xad1   : > { %v2589_v41 = vpop.f32.mrf.mxu0 }
 0xad2   : > { %2345 = vmatmul.mubr.msk.bf16.vlgmr.msra.gmra.mxu1 %vm1079_vm5, %v1819_v40 }
 0xad3   : > { %v1816_v42 = vpop.f32.mrf.mxu0  ;;  %2607 = vmatprep.mubr.msk.bf16.mxu1 %vm2748_vm1, %v2747_v5  ;;  %2592 = vmatpush3.bf16.msra.mxu1 %v2699_v49 }
 0xad4   : > { %2593 = vmatprep.subr.bf16.mxu1 %v2747_v5 }
 0xad5   : > { %v2590_v43 = vpop.f32.mrf.mxu0 }
 0xad7   : > { %2594 = vmatpush3.bf16.msra.mxu1 %v2700_v50 }
 0xad8   : > { %2595 = vmatprep.subr.bf16.mxu1 %v2747_v5 }
 0xadb   : > { %2596 = vmatpush3.bf16.msra.mxu1 %v2701_v51 }
 0xadc   : > { %2597 = vmatprep.subr.bf16.mxu1 %v2747_v5 }
 0xadf   : > { %v1950_v44 = vpop.f32.mrf.mxu0  ;;  %2598 = vmatpush3.bf16.msra.mxu1 %v2702_v52 }
 0xae0   : > { %2599 = vmatprep.subr.bf16.mxu1 %v2747_v5 }
 0xae1   : > { %v1952_v45 = vpop.f32.mrf.mxu0 }
 0xae3   : > { %v1954_v47 = vpop.f32.mrf.mxu0  ;;  %2600 = vmatpush3.bf16.msra.mxu1 %v2703_v53 }
 0xae4   : > { %2601 = vmatprep.subr.bf16.mxu1 %v2747_v5 }
 0xae5   : > { %v1955_v48 = vpop.f32.mrf.mxu0 }
 0xae7   : > { %2602 = vmatpush3.bf16.msra.mxu1 %v2704_v54 }
 0xae8   : > { %2603 = vmatprep.subr.bf16.mxu1 %v2747_v5 }
 0xaeb   : > { %2604 = vmatpush3.bf16.msra.mxu1 %v2705_v55 }
 0xaec   : > { %2605 = vmatprep.subr.bf16.mxu1 %v2747_v5 }
 0xaef   : > { %2606 = vmatpush3.bf16.msra.mxu1 %v2706_v56 }
 0xb92   : > { %v1869_v59 = vpop.f32.mrf.mxu1 }
 0xb93   : > { %v1951_v60 = vadd.f32 %v1950_v44, %v1869_v59 }
 0xb94   : > { %v1871_v61 = vpop.f32.mrf.mxu1 }
 0xb95   : > { %v2355_v62 = vmul.f32 -1.442695, %v1951_v60  ;;  %v1953_v7 = vadd.f32 %v1952_v45, %v1871_v61 }
 0xb96   : > { %v1873_v63 = vpop.f32.mrf.mxu1 }
 0xb97   : > { %2735 = vpow2.f32 %v2355_v62 }
 0xb98   : > { %v1874_v0 = vpop.f32.mrf.mxu1 }
 0xba4   : > { %v2736_v2 = vpop.eup %2735 }
 0xba5   : > { %v1960_v3 = vadd.f32 1.0, %v2736_v2 }
 0xba7   : > { %2737 = vrcp.f32 %v1960_v3 }
 0xbb4   : > { %v2738_v4 = vpop.eup %2737 }
 0xbb5   : > { %v1963_v6 = vmul.f32 %v2738_v4, %v1951_v60 }
 0xbb7   : > { %v1964_v8 = vmul.f32 %v1963_v6, %v1953_v7 }
 0xbb9   : > { %v1965_v9 = vpack.c.bf16 %v1964_v8, %v1964_v8 }
 0xbbb   : > { %2608 = vmatmul.mubr.bf16.vlgmr.msra.gmra.mxu1 %v1965_v9 }
 0xc7b   : > { %v2080_v10 = vpop.f32.mrf.mxu1 }
 0xc7c   : > { %v2086_v12 = vpack.c.bf16 %v2080_v10, %v2080_v10 }
 0xc7d   : > { %v2609_v13 = vpop.f32.mrf.mxu1 }
 0xc7e   : > { %2614 = vmatmul.mubr.msk.bf16.vlgmr.msra.gmra.mxu0 %vm1128_vm10, %v2086_v12 }
 0xc7f   : > { %2618 = vmatpush3.bf16.msra.mxu0 %v2707_v11  ;;  %v2083_v15 = vpop.f32.mrf.mxu1  ;;  %2633 = vmatprep.mubr.msk.bf16.mxu0 %vm2748_vm1, %v2747_v5 }
 0xc80   : > { %2619 = vmatprep.subr.bf16.mxu0 %v2747_v5 }
 0xc81   : > { %v2610_v18 = vpop.f32.mrf.mxu1 }
 0xc83   : > { %2620 = vmatpush3.bf16.msra.mxu0 %v2708_v16 }
 0xc84   : > { %2621 = vmatprep.subr.bf16.mxu0 %v2747_v5 }
 0xc87   : > { %2622 = vmatpush3.bf16.msra.mxu0 %v2709_v19 }
 0xc88   : > { %2623 = vmatprep.subr.bf16.mxu0 %v2747_v5 }
 0xc8b   : > { %2624 = vmatpush3.bf16.msra.mxu0 %v2710_v20 }
 0xc8c   : > { %2625 = vmatprep.subr.bf16.mxu0 %v2747_v5 }
 0xc8f   : > { %2626 = vmatpush3.bf16.msra.mxu0 %v2711_v46 }
 0xc90   : > { %2627 = vmatprep.subr.bf16.mxu0 %v2747_v5 }
 0xc93   : > { %2628 = vmatpush3.bf16.msra.mxu0 %v2712_v1 }
 0xc94   : > { %2629 = vmatprep.subr.bf16.mxu0 %v2747_v5 }
 0xc97   : > { %2630 = vmatpush3.bf16.msra.mxu0 %v2713_v21 }
 0xc98   : > { %2631 = vmatprep.subr.bf16.mxu0 %v2747_v5 }
 0xc9b   : > { %2632 = vmatpush3.bf16.msra.mxu0 %v2714_v22 }
 0xc9e   : > { %2634 = vmatmul.mubr.bf16.vlgmr.msra.gmra.mxu0 %v1965_v9 }
 0xd3e   : > { %v2128_v23 = vpop.f32.mrf.mxu0 }
 0xd40   : > { %v2615_v24 = vpop.f32.mrf.mxu0 }
 0xd42   : > { %v2131_v25 = vpop.f32.mrf.mxu0 }
 0xd44   : > { %v2616_v26 = vpop.f32.mrf.mxu0 }
 0xd5e   : > { %v2216_v27 = vpop.f32.mrf.mxu0 }
 0xd5f   : > { %v2217_v28 = vadd.f32 %v2216_v27, %v2128_v23 }
 0xd60   : > { %v2635_v29 = vpop.f32.mrf.mxu0 }
 0xd61   : > { %v2222_v30 = vadd.f32 %v2217_v28, %v3103_v14 }
 0xd62   : > { %v2219_v31 = vpop.f32.mrf.mxu0 }
 0xd63   : > { %v2223_v32 = vpack.c.bf16 %v2222_v30, %v2222_v30 }
 0xd64   : > { %v2636_v5 = vpop.f32.mrf.mxu0 }
 0xd65   : > { %2225 = vst.msk [vmem:[%s665_s24] sm:$0xf] %vm2224_vm12, %v2223_v32 }
 0xd66 PF: > { %s31_s2 = sadd.s32 1, %s2745_s2  }
 0xd67   : > { %p28_p4 = scmp.ge.s32.totalorder %s31_s2, 4  }
 0xd69   :  { %30 = sbr.rel (!%p28_p4) target bundleno = 7 (0x7), region = 137 }

</bundles_post_ra>
